<compile_context>
chip_gen: v5e
topology: v5e:2x2
jax: 0.10.0
libtpu: 0.0.40
codegen_flags: <defaults>
</compile_context>

<pallas_src>
import functools
import numpy as np
import jax
import jax.numpy as jnp
from jax.experimental import pallas as pl
from jax.experimental.pallas import tpu as pltpu


def _round_up(n, m):
    return (n + m - 1) // m * m


# ----------------------------- Pallas kernel ------------------------------ #
def lstm_kernel(x_ref, wih_ref, whh_ref, b_ref, out_ref):
    """Single-layer LSTM over a (T, D_in) sequence, batch=1.

    x_ref   : (T, D_in)      bf16  input sequence (lane-padded)
    wih_ref : (D_in, 4*D_h)  bf16  W_ih^T (candidate-gate block pre-scaled x2)
    whh_ref : (D_h,  4*D_h)  bf16  W_hh^T (candidate-gate block pre-scaled x2)
    b_ref   : (1, 4*D_h)     f32   b_ih + b_hh (candidate-gate block pre-scaled x2)
    out_ref : (Tp, D_h)      f32   hidden state h_t for t < T, zeros for t >= T
    """
    T = x_ref.shape[0]
    D = out_ref.shape[1]

    # Input contribution for all timesteps in one MXU matmul; kept in vregs,
    # so no per-step VMEM round-trip for the input gates.
    gates = jnp.dot(x_ref[...], wih_ref[...],
                    preferred_element_type=jnp.float32) + b_ref[...]

    h = jnp.zeros((1, D), jnp.float32)
    c = jnp.zeros((1, D), jnp.float32)
    hs = []

    # T=10, static unroll; h/c stay in vregs across iterations. The W_hh reads
    # inside the loop have no data dependence on the recurrence, so they sit
    # off the critical path and can be issued ahead by the scheduler.
    #
    # TODO(synk): perf review suggests making W_hh weight-stationary in the MXU
    # (pltpu.matmul_push_rhs once before the loop, matmul_acc_lhs/matmul_pop per
    # step, column-split across the 2x256 MXUs on v6e/v7x or 4x128 on v5e) to
    # drop 9 redundant RHS loads from the serial chain. This is explicitly
    # gated on a bundle dump confirming Mosaic does NOT already hoist the RHS
    # push out of this static unroll, so the portable jnp.dot is kept here.
    for t in range(T):
        g = gates[t:t + 1, :] + jnp.dot(
            h.astype(jnp.bfloat16), whh_ref[...],
            preferred_element_type=jnp.float32)

        # One fused sigmoid over the (1, 4D) gate vector; the candidate-gate
        # block preactivation is 2z, so tanh(z) = 2*sigmoid(2z) - 1.
        #
        # TODO(synk): perf review suggests packing g to (4, D) before the
        # sigmoid (EUP pushes 4 -> 1). In the value domain the pack + unpack
        # costs ~6 cross-sublane relayouts on the serial critical path, which
        # largely offsets the EUP saving; measurement-gated, so the
        # lane-sliced form is kept.
        s = jax.nn.sigmoid(g)
        i_g = s[:, 0 * D:1 * D]
        f_g = s[:, 1 * D:2 * D]
        g_g = 2.0 * s[:, 2 * D:3 * D] - 1.0   # == tanh(z)
        o_g = s[:, 3 * D:4 * D]
        c = f_g * c + i_g * g_g
        h = o_g * jnp.tanh(c)
        hs.append(h)

    # Flush all hidden states at once. Output rows are padded to a multiple of
    # 8 so this lowers to 2 unmasked full-tile stores instead of 10 masked
    # single-sublane vst.msk partial stores.
    pad_rows = out_ref.shape[0] - T
    if pad_rows:
        hs.append(jnp.zeros((pad_rows, D), jnp.float32))
    out_ref[...] = jnp.concatenate(hs, axis=0).astype(out_ref.dtype)


def lstm_pallas(seq_p, wih, whh, b, *, t_pad):
    """seq_p: (T, dp_in) bf16 (already padded), wih/whh: bf16 prepped weights,
    b: (1, 4*dp_h) f32 prepped bias.  Returns (t_pad, dp_h) f32 hidden states.

    NOTE(scaling guard, perf review): for these shapes everything is VMEM
    resident (<1 MiB) and fits the 64-vreg file comfortably. If out_dim grows
    (D_h >~ 1-2k), move `gates` into a VMEM scratch, tile the 4*D_h gate
    columns with a grid + BlockSpecs, and set
    pltpu.CompilerParams(vmem_limit_bytes=...); re-derive the budget against
    v7x's 64 MiB physical / 32 MiB default-scoped VMEM.
    """
    dp_h = whh.shape[0]
    return pl.pallas_call(
        lstm_kernel,
        out_shape=jax.ShapeDtypeStruct((t_pad, dp_h), jnp.float32),
        in_specs=[pl.BlockSpec(memory_space=pltpu.MemorySpace.VMEM)] * 4,
        out_specs=pl.BlockSpec(memory_space=pltpu.MemorySpace.VMEM),
    )(seq_p, wih, whh, b)


# ------------------------------ Parameters --------------------------------- #
def init_params(key, d_in, d_h):
    """PyTorch nn.LSTM init: uniform(-k, k), k = 1/sqrt(hidden_size).
    Gate (column-block) order is PyTorch's (i, f, g, o)."""
    k = 1.0 / np.sqrt(d_h)
    k0, k1, k2, k3 = jax.random.split(key, 4)
    w_ih = jax.random.uniform(k0, (4 * d_h, d_in), jnp.float32, -k, k)
    w_hh = jax.random.uniform(k1, (4 * d_h, d_h), jnp.float32, -k, k)
    b_ih = jax.random.uniform(k2, (4 * d_h,), jnp.float32, -k, k)
    b_hh = jax.random.uniform(k3, (4 * d_h,), jnp.float32, -k, k)
    return {"w_ih_t": w_ih.T, "w_hh_t": w_hh.T,
            "b": (b_ih + b_hh).reshape(1, 4 * d_h)}


def prep_params(raw, d_in, d_h):
    """One-time (hoisted) kernel parameter prep, per perf review:
      * scale the candidate-gate block by 2 (fused-sigmoid tanh trick),
      * zero-pad D_in / D_h up to multiples of 128 (lane-aligned gate slices),
      * cast the matmul operands to bf16.
    Done once at init time, NOT per forward call."""
    dp_in, dp_h = _round_up(d_in, 128), _round_up(d_h, 128)
    gate_scale = jnp.array([1.0, 1.0, 2.0, 1.0], jnp.float32)[None, :, None]

    def prep_w(w_t, rows, rows_p):
        w = w_t.reshape(rows, 4, d_h) * gate_scale
        w = jnp.pad(w, ((0, rows_p - rows), (0, 0), (0, dp_h - d_h)))
        return w.reshape(rows_p, 4 * dp_h).astype(jnp.bfloat16)

    b = raw["b"].reshape(1, 4, d_h) * gate_scale
    b = jnp.pad(b, ((0, 0), (0, 0), (0, dp_h - d_h))).reshape(1, 4 * dp_h)
    return {"wih": prep_w(raw["w_ih_t"], d_in, dp_in),
            "whh": prep_w(raw["w_hh_t"], d_h, dp_h),
            "b": b}


# ------------------------------ Model wrapper ------------------------------ #
@functools.partial(jax.jit,
                   static_argnames=("largest_w", "largest_h", "out_w", "out_h"))
def lstm_t7_forward(x, prepped, *, largest_w, largest_h, out_w, out_h):
    """x: (ch=10, input_w, input_h) f32 -> (1, 10, out_w, out_h)."""
    ch, iw, ih = x.shape
    assert ch == 10, "LSTM_T7 forward requires 10 channels"
    d_in = largest_w * largest_h
    d_h = out_w * out_h
    dp_in = prepped["wih"].shape[0]

    # TODO(synk): pad_crop is not defined in the source; assume top-left
    # anchored zero pad of the spatial dims.
    xp = jnp.zeros((ch, largest_w, largest_h), x.dtype).at[:, :iw, :ih].set(x)
    seq = xp.reshape(ch, d_in)                                    # (T=10, D_in)
    seq_p = jnp.pad(seq, ((0, 0), (0, dp_in - d_in))).astype(jnp.bfloat16)

    out = lstm_pallas(seq_p, prepped["wih"], prepped["whh"], prepped["b"],
                      t_pad=_round_up(ch, 8))
    # Attention(10,10) returns its input unchanged -> value-level no-op, and
    # torch.reshape never permutes the flat buffer, so this is the final value.
    return out[:ch, :d_h].reshape(1, ch, out_w, out_h)


# ------------------------------ Reference (JAX) ---------------------------- #
def lstm_ref(seq, w_ih_t, w_hh_t, bias):
    T, _ = seq.shape
    d_h = w_hh_t.shape[0]
    h = jnp.zeros((1, d_h), jnp.float32)
    c = jnp.zeros((1, d_h), jnp.float32)
    outs = []
    for t in range(T):
        g = seq[t:t + 1] @ w_ih_t + h @ w_hh_t + bias
        i = jax.nn.sigmoid(g[:, 0 * d_h:1 * d_h])
        f = jax.nn.sigmoid(g[:, 1 * d_h:2 * d_h])
        gg = jnp.tanh(g[:, 2 * d_h:3 * d_h])
        o = jax.nn.sigmoid(g[:, 3 * d_h:4 * d_h])
        c = f * c + i * gg
        h = o * jnp.tanh(c)
        outs.append(h)
    return jnp.concatenate(outs, axis=0)


# ---------------------------------- main ----------------------------------- #
if __name__ == "__main__":
    configs = [
        # (largest_w, largest_h, out_w, out_h, input_w, input_h)
        (8, 16, 8, 16, 6, 12),   # D_in = 128, D_h = 128 (lane-aligned)
        (7, 9, 5, 6, 5, 7),      # D_in = 63,  D_h = 30  (exercises padding)
    ]
    key = jax.random.PRNGKey(0)
    for lw, lh, ow, oh, iw, ih in configs:
        key, kx, kp = jax.random.split(key, 3)
        x = jax.random.normal(kx, (10, iw, ih), jnp.float32)
        raw = init_params(kp, lw * lh, ow * oh)
        # One-time hoisted prep (outside the per-call path).
        prepped = jax.block_until_ready(prep_params(raw, lw * lh, ow * oh))

        y = jax.block_until_ready(
            lstm_t7_forward(x, prepped,
                            largest_w=lw, largest_h=lh, out_w=ow, out_h=oh))
        assert y.shape == (1, 10, ow, oh), y.shape

        # Pure-JAX f32 reference (unscaled, unpadded params).
        xp = jnp.zeros((10, lw, lh), x.dtype).at[:, :iw, :ih].set(x)
        seq = xp.reshape(10, lw * lh)
        ref = lstm_ref(seq, raw["w_ih_t"], raw["w_hh_t"], raw["b"])
        ref = ref.reshape(1, 10, ow, oh)
        np.testing.assert_allclose(np.asarray(y), np.asarray(ref),
                                   rtol=2e-2, atol=2e-2)

    print("KERNEL_OK")
</pallas_src>

<mosaic_0001>
module attributes {stable_mosaic.version = 11 : i64} {
  func.func @lstm_kernel(%arg0: memref<10x128xbf16, #tpu.memory_space<vmem>>, %arg1: memref<128x512xbf16, #tpu.memory_space<vmem>>, %arg2: memref<128x512xbf16, #tpu.memory_space<vmem>>, %arg3: memref<1x512xf32, #tpu.memory_space<vmem>>, %arg4: memref<16x128xf32, #tpu.memory_space<vmem>>) attributes {dimension_semantics = [], scalar_prefetch = 0 : i64, scratch_operands = 0 : i64, tpu.core_type = #tpu.core_type<tc>} {
    %c0 = arith.constant 0 : index
    %c0_0 = arith.constant 0 : index
    %0 = vector.load %arg0[%c0, %c0_0] : memref<10x128xbf16, #tpu.memory_space<vmem>>, vector<10x128xbf16>
    %c0_1 = arith.constant 0 : index
    %c0_2 = arith.constant 0 : index
    %1 = vector.load %arg1[%c0_1, %c0_2] : memref<128x512xbf16, #tpu.memory_space<vmem>>, vector<128x512xbf16>
    %cst = arith.constant dense<0.000000e+00> : vector<10x512xf32>
    %2 = tpu.matmul %0, %1, %cst {dimension_numbers = #tpu.dot_dimension_numbers<[1], [0], [0], [1], [0, 0, 1, 1], [], []>} : vector<10x128xbf16>, vector<128x512xbf16>, vector<10x512xf32> -> vector<10x512xf32>
    %c0_3 = arith.constant 0 : index
    %c0_4 = arith.constant 0 : index
    %3 = vector.load %arg3[%c0_3, %c0_4] : memref<1x512xf32, #tpu.memory_space<vmem>>, vector<1x512xf32>
    %4 = vector.broadcast %3 : vector<1x512xf32> to vector<10x512xf32>
    %5 = arith.addf %2, %4 : vector<10x512xf32>
    %cst_5 = arith.constant 0.000000e+00 : f32
    %6 = vector.broadcast %cst_5 : f32 to vector<1x128xf32>
    %cst_6 = arith.constant 0.000000e+00 : f32
    %7 = vector.broadcast %cst_6 : f32 to vector<1x128xf32>
    %8 = vector.extract_strided_slice %5 {offsets = [0, 0], sizes = [1, 512], strides = [1, 1]} : vector<10x512xf32> to vector<1x512xf32>
    %9 = arith.truncf %6 : vector<1x128xf32> to vector<1x128xbf16>
    %c0_7 = arith.constant 0 : index
    %c0_8 = arith.constant 0 : index
    %10 = vector.load %arg2[%c0_7, %c0_8] : memref<128x512xbf16, #tpu.memory_space<vmem>>, vector<128x512xbf16>
    %cst_9 = arith.constant dense<0.000000e+00> : vector<1x512xf32>
    %11 = tpu.matmul %9, %10, %cst_9 {dimension_numbers = #tpu.dot_dimension_numbers<[1], [0], [0], [1], [0, 0, 1, 1], [], []>} : vector<1x128xbf16>, vector<128x512xbf16>, vector<1x512xf32> -> vector<1x512xf32>
    %12 = arith.addf %8, %11 : vector<1x512xf32>
    %13 = arith.negf %12 : vector<1x512xf32>
    %14 = math.exp %13 : vector<1x512xf32>
    %cst_10 = arith.constant 1.000000e+00 : f32
    %15 = vector.broadcast %cst_10 : f32 to vector<1x512xf32>
    %16 = arith.addf %15, %14 : vector<1x512xf32>
    %17 = arith.divf %15, %16 : vector<1x512xf32>
    %18 = vector.extract_strided_slice %17 {offsets = [0, 0], sizes = [1, 128], strides = [1, 1]} : vector<1x512xf32> to vector<1x128xf32>
    %19 = vector.extract_strided_slice %17 {offsets = [0, 128], sizes = [1, 128], strides = [1, 1]} : vector<1x512xf32> to vector<1x128xf32>
    %20 = vector.extract_strided_slice %17 {offsets = [0, 256], sizes = [1, 128], strides = [1, 1]} : vector<1x512xf32> to vector<1x128xf32>
    %cst_11 = arith.constant 2.000000e+00 : f32
    %21 = vector.broadcast %cst_11 : f32 to vector<1x128xf32>
    %22 = arith.mulf %21, %20 : vector<1x128xf32>
    %cst_12 = arith.constant 1.000000e+00 : f32
    %23 = vector.broadcast %cst_12 : f32 to vector<1x128xf32>
    %24 = arith.subf %22, %23 : vector<1x128xf32>
    %25 = vector.extract_strided_slice %17 {offsets = [0, 384], sizes = [1, 128], strides = [1, 1]} : vector<1x512xf32> to vector<1x128xf32>
    %26 = arith.mulf %19, %7 : vector<1x128xf32>
    %27 = arith.mulf %18, %24 : vector<1x128xf32>
    %28 = arith.addf %26, %27 : vector<1x128xf32>
    %29 = math.tanh %28 : vector<1x128xf32>
    %30 = arith.mulf %25, %29 : vector<1x128xf32>
    %31 = vector.extract_strided_slice %5 {offsets = [1, 0], sizes = [1, 512], strides = [1, 1]} : vector<10x512xf32> to vector<1x512xf32>
    %32 = arith.truncf %30 : vector<1x128xf32> to vector<1x128xbf16>
    %c0_13 = arith.constant 0 : index
    %c0_14 = arith.constant 0 : index
    %33 = vector.load %arg2[%c0_13, %c0_14] : memref<128x512xbf16, #tpu.memory_space<vmem>>, vector<128x512xbf16>
    %cst_15 = arith.constant dense<0.000000e+00> : vector<1x512xf32>
    %34 = tpu.matmul %32, %33, %cst_15 {dimension_numbers = #tpu.dot_dimension_numbers<[1], [0], [0], [1], [0, 0, 1, 1], [], []>} : vector<1x128xbf16>, vector<128x512xbf16>, vector<1x512xf32> -> vector<1x512xf32>
    %35 = arith.addf %31, %34 : vector<1x512xf32>
    %36 = arith.negf %35 : vector<1x512xf32>
    %37 = math.exp %36 : vector<1x512xf32>
    %cst_16 = arith.constant 1.000000e+00 : f32
    %38 = vector.broadcast %cst_16 : f32 to vector<1x512xf32>
    %39 = arith.addf %38, %37 : vector<1x512xf32>
    %40 = arith.divf %38, %39 : vector<1x512xf32>
    %41 = vector.extract_strided_slice %40 {offsets = [0, 0], sizes = [1, 128], strides = [1, 1]} : vector<1x512xf32> to vector<1x128xf32>
    %42 = vector.extract_strided_slice %40 {offsets = [0, 128], sizes = [1, 128], strides = [1, 1]} : vector<1x512xf32> to vector<1x128xf32>
    %43 = vector.extract_strided_slice %40 {offsets = [0, 256], sizes = [1, 128], strides = [1, 1]} : vector<1x512xf32> to vector<1x128xf32>
    %cst_17 = arith.constant 2.000000e+00 : f32
    %44 = vector.broadcast %cst_17 : f32 to vector<1x128xf32>
    %45 = arith.mulf %44, %43 : vector<1x128xf32>
    %cst_18 = arith.constant 1.000000e+00 : f32
    %46 = vector.broadcast %cst_18 : f32 to vector<1x128xf32>
    %47 = arith.subf %45, %46 : vector<1x128xf32>
    %48 = vector.extract_strided_slice %40 {offsets = [0, 384], sizes = [1, 128], strides = [1, 1]} : vector<1x512xf32> to vector<1x128xf32>
    %49 = arith.mulf %42, %28 : vector<1x128xf32>
    %50 = arith.mulf %41, %47 : vector<1x128xf32>
    %51 = arith.addf %49, %50 : vector<1x128xf32>
    %52 = math.tanh %51 : vector<1x128xf32>
    %53 = arith.mulf %48, %52 : vector<1x128xf32>
    %54 = vector.extract_strided_slice %5 {offsets = [2, 0], sizes = [1, 512], strides = [1, 1]} : vector<10x512xf32> to vector<1x512xf32>
    %55 = arith.truncf %53 : vector<1x128xf32> to vector<1x128xbf16>
    %c0_19 = arith.constant 0 : index
    %c0_20 = arith.constant 0 : index
    %56 = vector.load %arg2[%c0_19, %c0_20] : memref<128x512xbf16, #tpu.memory_space<vmem>>, vector<128x512xbf16>
    %cst_21 = arith.constant dense<0.000000e+00> : vector<1x512xf32>
    %57 = tpu.matmul %55, %56, %cst_21 {dimension_numbers = #tpu.dot_dimension_numbers<[1], [0], [0], [1], [0, 0, 1, 1], [], []>} : vector<1x128xbf16>, vector<128x512xbf16>, vector<1x512xf32> -> vector<1x512xf32>
    %58 = arith.addf %54, %57 : vector<1x512xf32>
    %59 = arith.negf %58 : vector<1x512xf32>
    %60 = math.exp %59 : vector<1x512xf32>
    %cst_22 = arith.constant 1.000000e+00 : f32
    %61 = vector.broadcast %cst_22 : f32 to vector<1x512xf32>
    %62 = arith.addf %61, %60 : vector<1x512xf32>
    %63 = arith.divf %61, %62 : vector<1x512xf32>
    %64 = vector.extract_strided_slice %63 {offsets = [0, 0], sizes = [1, 128], strides = [1, 1]} : vector<1x512xf32> to vector<1x128xf32>
    %65 = vector.extract_strided_slice %63 {offsets = [0, 128], sizes = [1, 128], strides = [1, 1]} : vector<1x512xf32> to vector<1x128xf32>
    %66 = vector.extract_strided_slice %63 {offsets = [0, 256], sizes = [1, 128], strides = [1, 1]} : vector<1x512xf32> to vector<1x128xf32>
    %cst_23 = arith.constant 2.000000e+00 : f32
    %67 = vector.broadcast %cst_23 : f32 to vector<1x128xf32>
    %68 = arith.mulf %67, %66 : vector<1x128xf32>
    %cst_24 = arith.constant 1.000000e+00 : f32
    %69 = vector.broadcast %cst_24 : f32 to vector<1x128xf32>
    %70 = arith.subf %68, %69 : vector<1x128xf32>
    %71 = vector.extract_strided_slice %63 {offsets = [0, 384], sizes = [1, 128], strides = [1, 1]} : vector<1x512xf32> to vector<1x128xf32>
    %72 = arith.mulf %65, %51 : vector<1x128xf32>
    %73 = arith.mulf %64, %70 : vector<1x128xf32>
    %74 = arith.addf %72, %73 : vector<1x128xf32>
    %75 = math.tanh %74 : vector<1x128xf32>
    %76 = arith.mulf %71, %75 : vector<1x128xf32>
    %77 = vector.extract_strided_slice %5 {offsets = [3, 0], sizes = [1, 512], strides = [1, 1]} : vector<10x512xf32> to vector<1x512xf32>
    %78 = arith.truncf %76 : vector<1x128xf32> to vector<1x128xbf16>
    %c0_25 = arith.constant 0 : index
    %c0_26 = arith.constant 0 : index
    %79 = vector.load %arg2[%c0_25, %c0_26] : memref<128x512xbf16, #tpu.memory_space<vmem>>, vector<128x512xbf16>
    %cst_27 = arith.constant dense<0.000000e+00> : vector<1x512xf32>
    %80 = tpu.matmul %78, %79, %cst_27 {dimension_numbers = #tpu.dot_dimension_numbers<[1], [0], [0], [1], [0, 0, 1, 1], [], []>} : vector<1x128xbf16>, vector<128x512xbf16>, vector<1x512xf32> -> vector<1x512xf32>
    %81 = arith.addf %77, %80 : vector<1x512xf32>
    %82 = arith.negf %81 : vector<1x512xf32>
    %83 = math.exp %82 : vector<1x512xf32>
    %cst_28 = arith.constant 1.000000e+00 : f32
    %84 = vector.broadcast %cst_28 : f32 to vector<1x512xf32>
    %85 = arith.addf %84, %83 : vector<1x512xf32>
    %86 = arith.divf %84, %85 : vector<1x512xf32>
    %87 = vector.extract_strided_slice %86 {offsets = [0, 0], sizes = [1, 128], strides = [1, 1]} : vector<1x512xf32> to vector<1x128xf32>
    %88 = vector.extract_strided_slice %86 {offsets = [0, 128], sizes = [1, 128], strides = [1, 1]} : vector<1x512xf32> to vector<1x128xf32>
    %89 = vector.extract_strided_slice %86 {offsets = [0, 256], sizes = [1, 128], strides = [1, 1]} : vector<1x512xf32> to vector<1x128xf32>
    %cst_29 = arith.constant 2.000000e+00 : f32
    %90 = vector.broadcast %cst_29 : f32 to vector<1x128xf32>
    %91 = arith.mulf %90, %89 : vector<1x128xf32>
    %cst_30 = arith.constant 1.000000e+00 : f32
    %92 = vector.broadcast %cst_30 : f32 to vector<1x128xf32>
    %93 = arith.subf %91, %92 : vector<1x128xf32>
    %94 = vector.extract_strided_slice %86 {offsets = [0, 384], sizes = [1, 128], strides = [1, 1]} : vector<1x512xf32> to vector<1x128xf32>
    %95 = arith.mulf %88, %74 : vector<1x128xf32>
    %96 = arith.mulf %87, %93 : vector<1x128xf32>
    %97 = arith.addf %95, %96 : vector<1x128xf32>
    %98 = math.tanh %97 : vector<1x128xf32>
    %99 = arith.mulf %94, %98 : vector<1x128xf32>
    %100 = vector.extract_strided_slice %5 {offsets = [4, 0], sizes = [1, 512], strides = [1, 1]} : vector<10x512xf32> to vector<1x512xf32>
    %101 = arith.truncf %99 : vector<1x128xf32> to vector<1x128xbf16>
    %c0_31 = arith.constant 0 : index
    %c0_32 = arith.constant 0 : index
    %102 = vector.load %arg2[%c0_31, %c0_32] : memref<128x512xbf16, #tpu.memory_space<vmem>>, vector<128x512xbf16>
    %cst_33 = arith.constant dense<0.000000e+00> : vector<1x512xf32>
    %103 = tpu.matmul %101, %102, %cst_33 {dimension_numbers = #tpu.dot_dimension_numbers<[1], [0], [0], [1], [0, 0, 1, 1], [], []>} : vector<1x128xbf16>, vector<128x512xbf16>, vector<1x512xf32> -> vector<1x512xf32>
    %104 = arith.addf %100, %103 : vector<1x512xf32>
    %105 = arith.negf %104 : vector<1x512xf32>
    %106 = math.exp %105 : vector<1x512xf32>
    %cst_34 = arith.constant 1.000000e+00 : f32
    %107 = vector.broadcast %cst_34 : f32 to vector<1x512xf32>
    %108 = arith.addf %107, %106 : vector<1x512xf32>
    %109 = arith.divf %107, %108 : vector<1x512xf32>
    %110 = vector.extract_strided_slice %109 {offsets = [0, 0], sizes = [1, 128], strides = [1, 1]} : vector<1x512xf32> to vector<1x128xf32>
    %111 = vector.extract_strided_slice %109 {offsets = [0, 128], sizes = [1, 128], strides = [1, 1]} : vector<1x512xf32> to vector<1x128xf32>
    %112 = vector.extract_strided_slice %109 {offsets = [0, 256], sizes = [1, 128], strides = [1, 1]} : vector<1x512xf32> to vector<1x128xf32>
    %cst_35 = arith.constant 2.000000e+00 : f32
    %113 = vector.broadcast %cst_35 : f32 to vector<1x128xf32>
    %114 = arith.mulf %113, %112 : vector<1x128xf32>
    %cst_36 = arith.constant 1.000000e+00 : f32
    %115 = vector.broadcast %cst_36 : f32 to vector<1x128xf32>
    %116 = arith.subf %114, %115 : vector<1x128xf32>
    %117 = vector.extract_strided_slice %109 {offsets = [0, 384], sizes = [1, 128], strides = [1, 1]} : vector<1x512xf32> to vector<1x128xf32>
    %118 = arith.mulf %111, %97 : vector<1x128xf32>
    %119 = arith.mulf %110, %116 : vector<1x128xf32>
    %120 = arith.addf %118, %119 : vector<1x128xf32>
    %121 = math.tanh %120 : vector<1x128xf32>
    %122 = arith.mulf %117, %121 : vector<1x128xf32>
    %123 = vector.extract_strided_slice %5 {offsets = [5, 0], sizes = [1, 512], strides = [1, 1]} : vector<10x512xf32> to vector<1x512xf32>
    %124 = arith.truncf %122 : vector<1x128xf32> to vector<1x128xbf16>
    %c0_37 = arith.constant 0 : index
    %c0_38 = arith.constant 0 : index
    %125 = vector.load %arg2[%c0_37, %c0_38] : memref<128x512xbf16, #tpu.memory_space<vmem>>, vector<128x512xbf16>
    %cst_39 = arith.constant dense<0.000000e+00> : vector<1x512xf32>
    %126 = tpu.matmul %124, %125, %cst_39 {dimension_numbers = #tpu.dot_dimension_numbers<[1], [0], [0], [1], [0, 0, 1, 1], [], []>} : vector<1x128xbf16>, vector<128x512xbf16>, vector<1x512xf32> -> vector<1x512xf32>
    %127 = arith.addf %123, %126 : vector<1x512xf32>
    %128 = arith.negf %127 : vector<1x512xf32>
    %129 = math.exp %128 : vector<1x512xf32>
    %cst_40 = arith.constant 1.000000e+00 : f32
    %130 = vector.broadcast %cst_40 : f32 to vector<1x512xf32>
    %131 = arith.addf %130, %129 : vector<1x512xf32>
    %132 = arith.divf %130, %131 : vector<1x512xf32>
    %133 = vector.extract_strided_slice %132 {offsets = [0, 0], sizes = [1, 128], strides = [1, 1]} : vector<1x512xf32> to vector<1x128xf32>
    %134 = vector.extract_strided_slice %132 {offsets = [0, 128], sizes = [1, 128], strides = [1, 1]} : vector<1x512xf32> to vector<1x128xf32>
    %135 = vector.extract_strided_slice %132 {offsets = [0, 256], sizes = [1, 128], strides = [1, 1]} : vector<1x512xf32> to vector<1x128xf32>
    %cst_41 = arith.constant 2.000000e+00 : f32
    %136 = vector.broadcast %cst_41 : f32 to vector<1x128xf32>
    %137 = arith.mulf %136, %135 : vector<1x128xf32>
    %cst_42 = arith.constant 1.000000e+00 : f32
    %138 = vector.broadcast %cst_42 : f32 to vector<1x128xf32>
    %139 = arith.subf %137, %138 : vector<1x128xf32>
    %140 = vector.extract_strided_slice %132 {offsets = [0, 384], sizes = [1, 128], strides = [1, 1]} : vector<1x512xf32> to vector<1x128xf32>
    %141 = arith.mulf %134, %120 : vector<1x128xf32>
    %142 = arith.mulf %133, %139 : vector<1x128xf32>
    %143 = arith.addf %141, %142 : vector<1x128xf32>
    %144 = math.tanh %143 : vector<1x128xf32>
    %145 = arith.mulf %140, %144 : vector<1x128xf32>
    %146 = vector.extract_strided_slice %5 {offsets = [6, 0], sizes = [1, 512], strides = [1, 1]} : vector<10x512xf32> to vector<1x512xf32>
    %147 = arith.truncf %145 : vector<1x128xf32> to vector<1x128xbf16>
    %c0_43 = arith.constant 0 : index
    %c0_44 = arith.constant 0 : index
    %148 = vector.load %arg2[%c0_43, %c0_44] : memref<128x512xbf16, #tpu.memory_space<vmem>>, vector<128x512xbf16>
    %cst_45 = arith.constant dense<0.000000e+00> : vector<1x512xf32>
    %149 = tpu.matmul %147, %148, %cst_45 {dimension_numbers = #tpu.dot_dimension_numbers<[1], [0], [0], [1], [0, 0, 1, 1], [], []>} : vector<1x128xbf16>, vector<128x512xbf16>, vector<1x512xf32> -> vector<1x512xf32>
    %150 = arith.addf %146, %149 : vector<1x512xf32>
    %151 = arith.negf %150 : vector<1x512xf32>
    %152 = math.exp %151 : vector<1x512xf32>
    %cst_46 = arith.constant 1.000000e+00 : f32
    %153 = vector.broadcast %cst_46 : f32 to vector<1x512xf32>
    %154 = arith.addf %153, %152 : vector<1x512xf32>
    %155 = arith.divf %153, %154 : vector<1x512xf32>
    %156 = vector.extract_strided_slice %155 {offsets = [0, 0], sizes = [1, 128], strides = [1, 1]} : vector<1x512xf32> to vector<1x128xf32>
    %157 = vector.extract_strided_slice %155 {offsets = [0, 128], sizes = [1, 128], strides = [1, 1]} : vector<1x512xf32> to vector<1x128xf32>
    %158 = vector.extract_strided_slice %155 {offsets = [0, 256], sizes = [1, 128], strides = [1, 1]} : vector<1x512xf32> to vector<1x128xf32>
    %cst_47 = arith.constant 2.000000e+00 : f32
    %159 = vector.broadcast %cst_47 : f32 to vector<1x128xf32>
    %160 = arith.mulf %159, %158 : vector<1x128xf32>
    %cst_48 = arith.constant 1.000000e+00 : f32
    %161 = vector.broadcast %cst_48 : f32 to vector<1x128xf32>
    %162 = arith.subf %160, %161 : vector<1x128xf32>
    %163 = vector.extract_strided_slice %155 {offsets = [0, 384], sizes = [1, 128], strides = [1, 1]} : vector<1x512xf32> to vector<1x128xf32>
    %164 = arith.mulf %157, %143 : vector<1x128xf32>
    %165 = arith.mulf %156, %162 : vector<1x128xf32>
    %166 = arith.addf %164, %165 : vector<1x128xf32>
    %167 = math.tanh %166 : vector<1x128xf32>
    %168 = arith.mulf %163, %167 : vector<1x128xf32>
    %169 = vector.extract_strided_slice %5 {offsets = [7, 0], sizes = [1, 512], strides = [1, 1]} : vector<10x512xf32> to vector<1x512xf32>
    %170 = arith.truncf %168 : vector<1x128xf32> to vector<1x128xbf16>
    %c0_49 = arith.constant 0 : index
    %c0_50 = arith.constant 0 : index
    %171 = vector.load %arg2[%c0_49, %c0_50] : memref<128x512xbf16, #tpu.memory_space<vmem>>, vector<128x512xbf16>
    %cst_51 = arith.constant dense<0.000000e+00> : vector<1x512xf32>
    %172 = tpu.matmul %170, %171, %cst_51 {dimension_numbers = #tpu.dot_dimension_numbers<[1], [0], [0], [1], [0, 0, 1, 1], [], []>} : vector<1x128xbf16>, vector<128x512xbf16>, vector<1x512xf32> -> vector<1x512xf32>
    %173 = arith.addf %169, %172 : vector<1x512xf32>
    %174 = arith.negf %173 : vector<1x512xf32>
    %175 = math.exp %174 : vector<1x512xf32>
    %cst_52 = arith.constant 1.000000e+00 : f32
    %176 = vector.broadcast %cst_52 : f32 to vector<1x512xf32>
    %177 = arith.addf %176, %175 : vector<1x512xf32>
    %178 = arith.divf %176, %177 : vector<1x512xf32>
    %179 = vector.extract_strided_slice %178 {offsets = [0, 0], sizes = [1, 128], strides = [1, 1]} : vector<1x512xf32> to vector<1x128xf32>
    %180 = vector.extract_strided_slice %178 {offsets = [0, 128], sizes = [1, 128], strides = [1, 1]} : vector<1x512xf32> to vector<1x128xf32>
    %181 = vector.extract_strided_slice %178 {offsets = [0, 256], sizes = [1, 128], strides = [1, 1]} : vector<1x512xf32> to vector<1x128xf32>
    %cst_53 = arith.constant 2.000000e+00 : f32
    %182 = vector.broadcast %cst_53 : f32 to vector<1x128xf32>
    %183 = arith.mulf %182, %181 : vector<1x128xf32>
    %cst_54 = arith.constant 1.000000e+00 : f32
    %184 = vector.broadcast %cst_54 : f32 to vector<1x128xf32>
    %185 = arith.subf %183, %184 : vector<1x128xf32>
    %186 = vector.extract_strided_slice %178 {offsets = [0, 384], sizes = [1, 128], strides = [1, 1]} : vector<1x512xf32> to vector<1x128xf32>
    %187 = arith.mulf %180, %166 : vector<1x128xf32>
    %188 = arith.mulf %179, %185 : vector<1x128xf32>
    %189 = arith.addf %187, %188 : vector<1x128xf32>
    %190 = math.tanh %189 : vector<1x128xf32>
    %191 = arith.mulf %186, %190 : vector<1x128xf32>
    %192 = vector.extract_strided_slice %5 {offsets = [8, 0], sizes = [1, 512], strides = [1, 1]} : vector<10x512xf32> to vector<1x512xf32>
    %193 = arith.truncf %191 : vector<1x128xf32> to vector<1x128xbf16>
    %c0_55 = arith.constant 0 : index
    %c0_56 = arith.constant 0 : index
    %194 = vector.load %arg2[%c0_55, %c0_56] : memref<128x512xbf16, #tpu.memory_space<vmem>>, vector<128x512xbf16>
    %cst_57 = arith.constant dense<0.000000e+00> : vector<1x512xf32>
    %195 = tpu.matmul %193, %194, %cst_57 {dimension_numbers = #tpu.dot_dimension_numbers<[1], [0], [0], [1], [0, 0, 1, 1], [], []>} : vector<1x128xbf16>, vector<128x512xbf16>, vector<1x512xf32> -> vector<1x512xf32>
    %196 = arith.addf %192, %195 : vector<1x512xf32>
    %197 = arith.negf %196 : vector<1x512xf32>
    %198 = math.exp %197 : vector<1x512xf32>
    %cst_58 = arith.constant 1.000000e+00 : f32
    %199 = vector.broadcast %cst_58 : f32 to vector<1x512xf32>
    %200 = arith.addf %199, %198 : vector<1x512xf32>
    %201 = arith.divf %199, %200 : vector<1x512xf32>
    %202 = vector.extract_strided_slice %201 {offsets = [0, 0], sizes = [1, 128], strides = [1, 1]} : vector<1x512xf32> to vector<1x128xf32>
    %203 = vector.extract_strided_slice %201 {offsets = [0, 128], sizes = [1, 128], strides = [1, 1]} : vector<1x512xf32> to vector<1x128xf32>
    %204 = vector.extract_strided_slice %201 {offsets = [0, 256], sizes = [1, 128], strides = [1, 1]} : vector<1x512xf32> to vector<1x128xf32>
    %cst_59 = arith.constant 2.000000e+00 : f32
    %205 = vector.broadcast %cst_59 : f32 to vector<1x128xf32>
    %206 = arith.mulf %205, %204 : vector<1x128xf32>
    %cst_60 = arith.constant 1.000000e+00 : f32
    %207 = vector.broadcast %cst_60 : f32 to vector<1x128xf32>
    %208 = arith.subf %206, %207 : vector<1x128xf32>
    %209 = vector.extract_strided_slice %201 {offsets = [0, 384], sizes = [1, 128], strides = [1, 1]} : vector<1x512xf32> to vector<1x128xf32>
    %210 = arith.mulf %203, %189 : vector<1x128xf32>
    %211 = arith.mulf %202, %208 : vector<1x128xf32>
    %212 = arith.addf %210, %211 : vector<1x128xf32>
    %213 = math.tanh %212 : vector<1x128xf32>
    %214 = arith.mulf %209, %213 : vector<1x128xf32>
    %215 = vector.extract_strided_slice %5 {offsets = [9, 0], sizes = [1, 512], strides = [1, 1]} : vector<10x512xf32> to vector<1x512xf32>
    %216 = arith.truncf %214 : vector<1x128xf32> to vector<1x128xbf16>
    %c0_61 = arith.constant 0 : index
    %c0_62 = arith.constant 0 : index
    %217 = vector.load %arg2[%c0_61, %c0_62] : memref<128x512xbf16, #tpu.memory_space<vmem>>, vector<128x512xbf16>
    %cst_63 = arith.constant dense<0.000000e+00> : vector<1x512xf32>
    %218 = tpu.matmul %216, %217, %cst_63 {dimension_numbers = #tpu.dot_dimension_numbers<[1], [0], [0], [1], [0, 0, 1, 1], [], []>} : vector<1x128xbf16>, vector<128x512xbf16>, vector<1x512xf32> -> vector<1x512xf32>
    %219 = arith.addf %215, %218 : vector<1x512xf32>
    %220 = arith.negf %219 : vector<1x512xf32>
    %221 = math.exp %220 : vector<1x512xf32>
    %cst_64 = arith.constant 1.000000e+00 : f32
    %222 = vector.broadcast %cst_64 : f32 to vector<1x512xf32>
    %223 = arith.addf %222, %221 : vector<1x512xf32>
    %224 = arith.divf %222, %223 : vector<1x512xf32>
    %225 = vector.extract_strided_slice %224 {offsets = [0, 0], sizes = [1, 128], strides = [1, 1]} : vector<1x512xf32> to vector<1x128xf32>
    %226 = vector.extract_strided_slice %224 {offsets = [0, 128], sizes = [1, 128], strides = [1, 1]} : vector<1x512xf32> to vector<1x128xf32>
    %227 = vector.extract_strided_slice %224 {offsets = [0, 256], sizes = [1, 128], strides = [1, 1]} : vector<1x512xf32> to vector<1x128xf32>
    %cst_65 = arith.constant 2.000000e+00 : f32
    %228 = vector.broadcast %cst_65 : f32 to vector<1x128xf32>
    %229 = arith.mulf %228, %227 : vector<1x128xf32>
    %cst_66 = arith.constant 1.000000e+00 : f32
    %230 = vector.broadcast %cst_66 : f32 to vector<1x128xf32>
    %231 = arith.subf %229, %230 : vector<1x128xf32>
    %232 = vector.extract_strided_slice %224 {offsets = [0, 384], sizes = [1, 128], strides = [1, 1]} : vector<1x512xf32> to vector<1x128xf32>
    %233 = arith.mulf %226, %212 : vector<1x128xf32>
    %234 = arith.mulf %225, %231 : vector<1x128xf32>
    %235 = arith.addf %233, %234 : vector<1x128xf32>
    %236 = math.tanh %235 : vector<1x128xf32>
    %237 = arith.mulf %232, %236 : vector<1x128xf32>
    %cst_67 = arith.constant 0.000000e+00 : f32
    %238 = vector.broadcast %cst_67 : f32 to vector<6x128xf32>
    %239 = tpu.concatenate %30, %53, %76, %99, %122, %145, %168, %191, %214, %237, %238 in 0 : vector<1x128xf32>, vector<1x128xf32>, vector<1x128xf32>, vector<1x128xf32>, vector<1x128xf32>, vector<1x128xf32>, vector<1x128xf32>, vector<1x128xf32>, vector<1x128xf32>, vector<1x128xf32>, vector<6x128xf32> -> vector<16x128xf32>
    %c0_68 = arith.constant 0 : index
    %c0_69 = arith.constant 0 : index
    %240 = vector.load %arg4[%c0_68, %c0_69] : memref<16x128xf32, #tpu.memory_space<vmem>>, vector<16x128xf32>
    tpu.vector_store %arg4[%c0_68, %c0_69], %239 {strides = array<i32>} : memref<16x128xf32, #tpu.memory_space<vmem>>, vector<16x128xf32>,
    return
  }
}

</mosaic_0001>

<bundles_post_ra>
// kernel: lstm_t7_forward.1
= control target key start
LH: loop header
LB: loop body
LE: loop exit
PB: predicated region body
PF: predicated region fallthrough
CT: control target
= control target key end

     0   :  { %9 = vsyncpa [#allocation3], 0  ;;  %s3378_s0 = inlined_call_operand.vmem [shape: bf16[10,128], index: 0, kind: input, shape index: {}]   ;;  %s3379_s1 = inlined_call_operand.hbm [shape: bf16[128,512], index: 1, kind: input, shape index: {}]   ;;  %s3380_s2 = inlined_call_operand.hbm [shape: bf16[128,512], index: 2, kind: input, shape index: {}]   ;;  %s3381_s3 = inlined_call_operand.vmem [shape: f32[1,512], index: 3, kind: input, shape index: {}]   ;;  %s3382_s4 = inlined_call_operand.vmem [shape: f32[16,128], index: 4, kind: output, shape index: {}]  }
   0x1   :  { %s17_s17 = sshll.u32 %s3379_s1, 4  ;;  %s18_s17 = int_to_ptr.hbm [resolvable:$true] %s17_s17 }
   0x2   :  { %10 = vsyncpa [#allocation5], 0  ;;  %s2694_s18 = smov [#allocation2]   ;;  %s30_s22 = sshll.u32 %s3380_s2, 4  ;;  %s31_s22 = int_to_ptr.hbm [resolvable:$true] %s30_s22 }
   0x3   :  { %s19_s19 = sshll.u32 %s2694_s18, 4  ;;  %s2695_s23 = smov 256   ;;  %s20_s19 = int_to_ptr.vmem [resolvable:$true] %s19_s19 }
   0x4   :  { %s2696_s24 = smov 16   ;;  %s2697_s25 = smov [#allocation4]  }
   0x5   :  { %25 = dma.hbm_to_vmem [thread:$0]  %s18_s17, 4096, %s20_s19, [#allocation3], %s2695_s23, %s2695_s23, %s2696_s24  }
   0x6   :  { %s32_s26 = sshll.u32 %s2697_s25, 4  ;;  %s33_s26 = int_to_ptr.vmem [resolvable:$true] %s32_s26 }
   0x7   :  { %38 = dma.hbm_to_vmem [thread:$0]  %s31_s22, 4096, %s33_s26, [#allocation5], %s2695_s23, %s2695_s23, %s2696_s24  }
   0x8   :  { %2690 = dma.done.wait [#allocation3], 4096  }
   0x9   :  { %2691 = vsyncadd [#allocation3], 4294963200 }
   0xa   :  { %2692 = dma.done.wait [#allocation5], 4096  }
   0xb   :  { %2693 = vsyncadd [#allocation5], 4294963200  ;;  %v2200_v0 = vld [vmem:[#allocation2 + $0xe0] sm:$0xf]  ;;  %v2423_v1 = vld [vmem:[#allocation2 + $0xec] sm:$0xf0] }
   0xc   :  { %v2421_v2 = vld [vmem:[#allocation2 + $0xe4] sm:$0xf]  ;;  %v2201_v3 = vor.u32 %v2423_v1, %v2200_v0  ;;  %v2202_v4 = vld [vmem:[#allocation2 + $0xf0] sm:$0xf0]  ;;  %v2208_v5 = vld [vmem:[#allocation2 + $0xe8] sm:$0xf] }
   0xd   :  { %v2424_v6 = vld [vmem:[#allocation2 + $0xf4] sm:$0xf0]  ;;  %v2205_v7 = vor.u32 %v2421_v2, %v2202_v4  ;;  %v2422_v9 = vld [vmem:[#allocation2 + $0xec] sm:$0xf]  ;;  %v2210_v10 = vld [vmem:[#allocation2 + $0xf8] sm:$0xf0] }
   0xe   :  { %v2209_v8 = vor.u32 %v2424_v6, %v2208_v5  ;;  %v2184_v11 = vld [vmem:[#allocation2 + $0xc0] sm:$0xf]  ;;  %260 = vmatpush.bf16.msra.mxu0 %v2201_v3  ;;  %v2213_v12 = vor.u32 %v2422_v9, %v2210_v10  ;;  %v2419_v13 = vld [vmem:[#allocation2 + $0xcc] sm:$0xf0]  ;;  %v2417_v14 = vld [vmem:[#allocation2 + $0xc4] sm:$0xf] }
   0xf   :  { %v2186_v15 = vld [vmem:[#allocation2 + $0xd0] sm:$0xf0]  ;;  %274 = vmatpush.bf16.msra.mxu1 %v2205_v7  ;;  %v2185_v16 = vor.u32 %v2419_v13, %v2184_v11  ;;  %v2192_v18 = vld [vmem:[#allocation2 + $0xc8] sm:$0xf]  ;;  %v2420_v19 = vld [vmem:[#allocation2 + $0xd4] sm:$0xf0] }
  0x10   :  { %288 = vmatpush.bf16.msra.mxu2 %v2209_v8  ;;  %v2189_v17 = vor.u32 %v2417_v14, %v2186_v15  ;;  %v2418_v20 = vld [vmem:[#allocation2 + $0xcc] sm:$0xf]  ;;  %302 = vmatpush.bf16.msra.mxu3 %v2213_v12  ;;  %v2193_v21 = vor.u32 %v2420_v19, %v2192_v18  ;;  %v2194_v22 = vld [vmem:[#allocation2 + $0xd8] sm:$0xf0]  ;;  %v2168_v23 = vld [vmem:[#allocation2 + $0xa0] sm:$0xf] }
  0x11   :  { %v2415_v24 = vld [vmem:[#allocation2 + $0xac] sm:$0xf0]  ;;  %v2197_v25 = vor.u32 %v2418_v20, %v2194_v22  ;;  %v2413_v26 = vld [vmem:[#allocation2 + $0xa4] sm:$0xf]  ;;  %v2170_v27 = vld [vmem:[#allocation2 + $0xb0] sm:$0xf0] }
  0x12   :  { %v2176_v28 = vld [vmem:[#allocation2 + $0xa8] sm:$0xf]  ;;  %261 = vmatpush.bf16.msra.mxu0 %v2185_v16  ;;  %v2169_v29 = vor.u32 %v2415_v24, %v2168_v23  ;;  %v2416_v30 = vld [vmem:[#allocation2 + $0xb4] sm:$0xf0]  ;;  %v2414_v31 = vld [vmem:[#allocation2 + $0xac] sm:$0xf]  ;;  %v2173_v33 = vor.u32 %v2413_v26, %v2170_v27 }
  0x13   :  { %v2178_v32 = vld [vmem:[#allocation2 + $0xb8] sm:$0xf0]  ;;  %275 = vmatpush.bf16.msra.mxu1 %v2189_v17  ;;  %v2177_v34 = vor.u32 %v2416_v30, %v2176_v28  ;;  %v2152_v35 = vld [vmem:[#allocation2 + $0x80] sm:$0xf]  ;;  %v2411_v36 = vld [vmem:[#allocation2 + $0x8c] sm:$0xf0] }
  0x14   :  { %289 = vmatpush.bf16.msra.mxu2 %v2193_v21  ;;  %v2409_v37 = vld [vmem:[#allocation2 + $0x84] sm:$0xf]  ;;  %303 = vmatpush.bf16.msra.mxu3 %v2197_v25  ;;  %v2181_v38 = vor.u32 %v2414_v31, %v2178_v32  ;;  %v2154_v39 = vld [vmem:[#allocation2 + $0x90] sm:$0xf0]  ;;  %v2160_v40 = vld [vmem:[#allocation2 + $0x88] sm:$0xf]  ;;  %v2153_v44 = vor.u32 %v2411_v36, %v2152_v35 }
  0x15   :  { %v2412_v41 = vld [vmem:[#allocation2 + $0x94] sm:$0xf0]  ;;  %v2410_v42 = vld [vmem:[#allocation2 + $0x8c] sm:$0xf]  ;;  %v2162_v43 = vld [vmem:[#allocation2 + $0x98] sm:$0xf0]  ;;  %v2157_v45 = vor.u32 %v2409_v37, %v2154_v39 }
  0x16   :  { %262 = vmatpush.bf16.msra.mxu0 %v2169_v29  ;;  %v2161_v46 = vor.u32 %v2412_v41, %v2160_v40  ;;  %v2136_v47 = vld [vmem:[#allocation2 + $0x60] sm:$0xf]  ;;  %v2407_v48 = vld [vmem:[#allocation2 + $0x6c] sm:$0xf0]  ;;  %v2405_v49 = vld [vmem:[#allocation2 + $0x64] sm:$0xf]  ;;  %v2165_v50 = vor.u32 %v2410_v42, %v2162_v43 }
  0x17   :  { %276 = vmatpush.bf16.msra.mxu1 %v2173_v33  ;;  %v2138_v51 = vld [vmem:[#allocation2 + $0x70] sm:$0xf0]  ;;  %v2144_v52 = vld [vmem:[#allocation2 + $0x68] sm:$0xf]  ;;  %v2408_v53 = vld [vmem:[#allocation2 + $0x74] sm:$0xf0]  ;;  %v2137_v56 = vor.u32 %v2407_v48, %v2136_v47 }
  0x18   :  { %290 = vmatpush.bf16.msra.mxu2 %v2177_v34  ;;  %304 = vmatpush.bf16.msra.mxu3 %v2181_v38  ;;  %v2406_v54 = vld [vmem:[#allocation2 + $0x6c] sm:$0xf]  ;;  %v2146_v55 = vld [vmem:[#allocation2 + $0x78] sm:$0xf0]  ;;  %v2141_v57 = vor.u32 %v2405_v49, %v2138_v51  ;;  %v2145_v58 = vor.u32 %v2408_v53, %v2144_v52  ;;  %v2120_v59 = vld [vmem:[#allocation2 + $0x40] sm:$0xf] }
  0x19   :  { %v2403_v60 = vld [vmem:[#allocation2 + $0x4c] sm:$0xf0]  ;;  %v2401_v61 = vld [vmem:[#allocation2 + $0x44] sm:$0xf]  ;;  %v2149_v62 = vor.u32 %v2406_v54, %v2146_v55  ;;  %v2122_v63 = vld [vmem:[#allocation2 + $0x50] sm:$0xf0] }
  0x1a   :  { %263 = vmatpush.bf16.msra.mxu0 %v2153_v44  ;;  %v2128_v0 = vld [vmem:[#allocation2 + $0x48] sm:$0xf]  ;;  %v2404_v1 = vld [vmem:[#allocation2 + $0x54] sm:$0xf0]  ;;  %v2402_v2 = vld [vmem:[#allocation2 + $0x4c] sm:$0xf]  ;;  %v2121_v4 = vor.u32 %v2403_v60, %v2120_v59  ;;  %v2125_v5 = vor.u32 %v2401_v61, %v2122_v63 }
  0x1b   :  { %277 = vmatpush.bf16.msra.mxu1 %v2157_v45  ;;  %v2130_v3 = vld [vmem:[#allocation2 + $0x58] sm:$0xf0]  ;;  %v2129_v6 = vor.u32 %v2404_v1, %v2128_v0  ;;  %v2104_v7 = vld [vmem:[#allocation2 + $0x20] sm:$0xf]  ;;  %v2399_v8 = vld [vmem:[#allocation2 + $0x2c] sm:$0xf0] }
  0x1c   :  { %291 = vmatpush.bf16.msra.mxu2 %v2161_v46  ;;  %305 = vmatpush.bf16.msra.mxu3 %v2165_v50  ;;  %v2397_v9 = vld [vmem:[#allocation2 + $0x24] sm:$0xf]  ;;  %v2133_v10 = vor.u32 %v2402_v2, %v2130_v3  ;;  %v2106_v11 = vld [vmem:[#allocation2 + $0x30] sm:$0xf0]  ;;  %v2112_v12 = vld [vmem:[#allocation2 + $0x28] sm:$0xf]  ;;  %v2105_v16 = vor.u32 %v2399_v8, %v2104_v7 }
  0x1d   :  { %v2400_v13 = vld [vmem:[#allocation2 + $0x34] sm:$0xf0]  ;;  %v2398_v14 = vld [vmem:[#allocation2 + $0x2c] sm:$0xf]  ;;  %v2114_v15 = vld [vmem:[#allocation2 + $0x38] sm:$0xf0]  ;;  %v2109_v20 = vor.u32 %v2397_v9, %v2106_v11 }
  0x1e   :  { %264 = vmatpush.bf16.msra.mxu0 %v2137_v56  ;;  %v2088_v17 = vld [vmem:[#allocation2] sm:$0xf]  ;;  %v2395_v18 = vld [vmem:[#allocation2 + $0xc] sm:$0xf0]  ;;  %v2393_v19 = vld [vmem:[#allocation2 + $0x4] sm:$0xf]  ;;  %v2113_v21 = vor.u32 %v2400_v13, %v2112_v12  ;;  %v2117_v25 = vor.u32 %v2398_v14, %v2114_v15 }
  0x1f   :  { %278 = vmatpush.bf16.msra.mxu1 %v2141_v57  ;;  %v2090_v22 = vld [vmem:[#allocation2 + $0x10] sm:$0xf0]  ;;  %v2096_v23 = vld [vmem:[#allocation2 + $0x8] sm:$0xf]  ;;  %v2396_v24 = vld [vmem:[#allocation2 + $0x14] sm:$0xf0]  ;;  %v2089_v32 = vor.u32 %v2395_v18, %v2088_v17 }
  0x20   :  { %292 = vmatpush.bf16.msra.mxu2 %v2145_v58  ;;  %306 = vmatpush.bf16.msra.mxu3 %v2149_v62  ;;  %v2394_v26 = vld [vmem:[#allocation2 + $0xc] sm:$0xf]  ;;  %v2098_v27 = vld [vmem:[#allocation2 + $0x18] sm:$0xf0]  ;;  %v2328_v28 = vld [vmem:[#allocation4 + $0xe0] sm:$0xf]  ;;  %v2093_v36 = vor.u32 %v2393_v19, %v2090_v22  ;;  %v2097_v37 = vor.u32 %v2396_v24, %v2096_v23 }
  0x21   :  { %v2455_v29 = vld [vmem:[#allocation4 + $0xec] sm:$0xf0]  ;;  %v2453_v30 = vld [vmem:[#allocation4 + $0xe4] sm:$0xf]  ;;  %v2330_v31 = vld [vmem:[#allocation4 + $0xf0] sm:$0xf0]  ;;  %v2101_v41 = vor.u32 %v2394_v26, %v2098_v27 }
  0x22   :  { %265 = vmatpush.bf16.msra.mxu0 %v2121_v4  ;;  %v2336_v33 = vld [vmem:[#allocation4 + $0xe8] sm:$0xf]  ;;  %v2456_v34 = vld [vmem:[#allocation4 + $0xf4] sm:$0xf0]  ;;  %v2454_v35 = vld [vmem:[#allocation4 + $0xec] sm:$0xf]  ;;  %v2736_v42 = vor.u32 %v2455_v29, %v2328_v28  ;;  %v2738_v43 = vor.u32 %v2453_v30, %v2330_v31 }
  0x23   :  { %279 = vmatpush.bf16.msra.mxu1 %v2125_v5  ;;  %v2338_v38 = vld [vmem:[#allocation4 + $0xf8] sm:$0xf0]  ;;  %v2084_v39 = vld [vmem:[%s3378_s0] sm:$0xf]  ;;  %v2392_v40 = vld [vmem:[%s3378_s0] sm:$0x10]  ;;  %v2740_v44 = vor.u32 %v2456_v34, %v2336_v33 }
  0x24   :  { %293 = vmatpush.bf16.msra.mxu2 %v2129_v6  ;;  %307 = vmatpush.bf16.msra.mxu3 %v2133_v10  ;;  %v2312_v45 = vld [vmem:[#allocation4 + $0xc0] sm:$0xf]  ;;  %v2451_v46 = vld [vmem:[#allocation4 + $0xcc] sm:$0xf0]  ;;  %v2449_v47 = vld [vmem:[#allocation4 + $0xc4] sm:$0xf]  ;;  %v2742_v48 = vor.u32 %v2454_v35, %v2338_v38  ;;  %v2085_v52 = vor.u32 %v2392_v40, %v2084_v39 }
  0x25   :  { %v2314_v49 = vld [vmem:[#allocation4 + $0xd0] sm:$0xf0]  ;;  %v2320_v50 = vld [vmem:[#allocation4 + $0xc8] sm:$0xf]  ;;  %v2452_v51 = vld [vmem:[#allocation4 + $0xd4] sm:$0xf0]  ;;  %v2745_v55 = vor.u32 %v2451_v46, %v2312_v45 }
  0x26   :  { %266 = vmatpush.bf16.msra.mxu0 %v2105_v16  ;;  %v2450_v53 = vld [vmem:[#allocation4 + $0xcc] sm:$0xf]  ;;  %v2322_v54 = vld [vmem:[#allocation4 + $0xd8] sm:$0xf0]  ;;  %v2749_v56 = vor.u32 %v2449_v47, %v2314_v49  ;;  %v2751_v57 = vor.u32 %v2452_v51, %v2320_v50  ;;  %v2296_v58 = vld [vmem:[#allocation4 + $0xa0] sm:$0xf] }
  0x27   :  { %280 = vmatpush.bf16.msra.mxu1 %v2109_v20  ;;  %v2447_v59 = vld [vmem:[#allocation4 + $0xac] sm:$0xf0]  ;;  %v2445_v60 = vld [vmem:[#allocation4 + $0xa4] sm:$0xf]  ;;  %v2754_v61 = vor.u32 %v2450_v53, %v2322_v54  ;;  %v2298_v62 = vld [vmem:[#allocation4 + $0xb0] sm:$0xf0] }
  0x28   :  { %294 = vmatpush.bf16.msra.mxu2 %v2113_v21  ;;  %308 = vmatpush.bf16.msra.mxu3 %v2117_v25  ;;  %v2304_v63 = vld [vmem:[#allocation4 + $0xa8] sm:$0xf]  ;;  %v2448_v0 = vld [vmem:[#allocation4 + $0xb4] sm:$0xf0]  ;;  %v2446_v1 = vld [vmem:[#allocation4 + $0xac] sm:$0xf]  ;;  %v2757_v3 = vor.u32 %v2447_v59, %v2296_v58  ;;  %v2761_v4 = vor.u32 %v2445_v60, %v2298_v62 }
  0x29   :  { %v2306_v2 = vld [vmem:[#allocation4 + $0xb8] sm:$0xf0]  ;;  %v2763_v5 = vor.u32 %v2448_v0, %v2304_v63  ;;  %v2280_v6 = vld [vmem:[#allocation4 + $0x80] sm:$0xf]  ;;  %v2443_v7 = vld [vmem:[#allocation4 + $0x8c] sm:$0xf0] }
  0x2a   :  { %267 = vmatpush.bf16.msra.mxu0 %v2089_v32  ;;  %v2441_v8 = vld [vmem:[#allocation4 + $0x84] sm:$0xf]  ;;  %v2766_v9 = vor.u32 %v2446_v1, %v2306_v2  ;;  %v2282_v10 = vld [vmem:[#allocation4 + $0x90] sm:$0xf0]  ;;  %v2288_v11 = vld [vmem:[#allocation4 + $0x88] sm:$0xf]  ;;  %v2769_v15 = vor.u32 %v2443_v7, %v2280_v6 }
  0x2b   :  { %281 = vmatpush.bf16.msra.mxu1 %v2093_v36  ;;  %v2444_v12 = vld [vmem:[#allocation4 + $0x94] sm:$0xf0]  ;;  %v2442_v13 = vld [vmem:[#allocation4 + $0x8c] sm:$0xf]  ;;  %v2290_v14 = vld [vmem:[#allocation4 + $0x98] sm:$0xf0]  ;;  %v2773_v16 = vor.u32 %v2441_v8, %v2282_v10 }
  0x2c   :  { %295 = vmatpush.bf16.msra.mxu2 %v2097_v37  ;;  %309 = vmatpush.bf16.msra.mxu3 %v2101_v41  ;;  %v2775_v17 = vor.u32 %v2444_v12, %v2288_v11  ;;  %v2264_v18 = vld [vmem:[#allocation4 + $0x60] sm:$0xf]  ;;  %v2439_v19 = vld [vmem:[#allocation4 + $0x6c] sm:$0xf0]  ;;  %v2437_v20 = vld [vmem:[#allocation4 + $0x64] sm:$0xf]  ;;  %v2778_v21 = vor.u32 %v2442_v13, %v2290_v14 }
  0x2d   :  { %268 = vmatmul.bf16.vlgmr.msra.gmra.mxu0 %v2085_v52  ;;  %v2266_v22 = vld [vmem:[#allocation4 + $0x70] sm:$0xf0]  ;;  %v2272_v23 = vld [vmem:[#allocation4 + $0x68] sm:$0xf]  ;;  %v2440_v24 = vld [vmem:[#allocation4 + $0x74] sm:$0xf0]  ;;  %v2781_v27 = vor.u32 %v2439_v19, %v2264_v18 }
  0x2e   :  { %508 = vmatpush.bf16.msrb.mxu0 %v2736_v42  ;;  %282 = vmatmul.bf16.vlgmr.msra.gmra.mxu1 %v2085_v52  ;;  %v2438_v25 = vld [vmem:[#allocation4 + $0x6c] sm:$0xf]  ;;  %v2274_v26 = vld [vmem:[#allocation4 + $0x78] sm:$0xf0]  ;;  %v2785_v28 = vor.u32 %v2437_v20, %v2266_v22  ;;  %v2787_v29 = vor.u32 %v2440_v24, %v2272_v23  ;;  %v2248_v30 = vld [vmem:[#allocation4 + $0x40] sm:$0xf] }
  0x2f   :  { %521 = vmatpush.bf16.msrb.mxu1 %v2738_v43  ;;  %296 = vmatmul.bf16.vlgmr.msra.gmra.mxu2 %v2085_v52  ;;  %v2435_v31 = vld [vmem:[#allocation4 + $0x4c] sm:$0xf0]  ;;  %v2433_v32 = vld [vmem:[#allocation4 + $0x44] sm:$0xf]  ;;  %v2790_v33 = vor.u32 %v2438_v25, %v2274_v26  ;;  %v2250_v34 = vld [vmem:[#allocation4 + $0x50] sm:$0xf0] }
  0x30   :  { %534 = vmatpush.bf16.msrb.mxu2 %v2740_v44  ;;  %547 = vmatpush.bf16.msrb.mxu3 %v2742_v48  ;;  %v2256_v35 = vld [vmem:[#allocation4 + $0x48] sm:$0xf]  ;;  %v2436_v36 = vld [vmem:[#allocation4 + $0x54] sm:$0xf0]  ;;  %v2434_v37 = vld [vmem:[#allocation4 + $0x4c] sm:$0xf]  ;;  %v2793_v39 = vor.u32 %v2435_v31, %v2248_v30  ;;  %v2797_v40 = vor.u32 %v2433_v32, %v2250_v34 }
  0x31   :  { %310 = vmatmul.bf16.vlgmr.msra.gmra.mxu3 %v2085_v52  ;;  %v2258_v38 = vld [vmem:[#allocation4 + $0x58] sm:$0xf0]  ;;  %v2799_v41 = vor.u32 %v2436_v36, %v2256_v35  ;;  %v2232_v45 = vld [vmem:[#allocation4 + $0x20] sm:$0xf]  ;;  %v2431_v46 = vld [vmem:[#allocation4 + $0x2c] sm:$0xf0] }
  0x32   :  { %509 = vmatpush.bf16.msrb.mxu0 %v2745_v55  ;;  %v2429_v47 = vld [vmem:[#allocation4 + $0x24] sm:$0xf]  ;;  %v2802_v49 = vor.u32 %v2434_v37, %v2258_v38  ;;  %v2234_v50 = vld [vmem:[#allocation4 + $0x30] sm:$0xf0]  ;;  %v2240_v51 = vld [vmem:[#allocation4 + $0x28] sm:$0xf]  ;;  %v2805_v58 = vor.u32 %v2431_v46, %v2232_v45 }
  0x33   :  { %522 = vmatpush.bf16.msrb.mxu1 %v2749_v56  ;;  %v2432_v52 = vld [vmem:[#allocation4 + $0x34] sm:$0xf0]  ;;  %v2430_v53 = vld [vmem:[#allocation4 + $0x2c] sm:$0xf]  ;;  %v2242_v54 = vld [vmem:[#allocation4 + $0x38] sm:$0xf0]  ;;  %v2809_v59 = vor.u32 %v2429_v47, %v2234_v50 }
  0x34   :  { %535 = vmatpush.bf16.msrb.mxu2 %v2751_v57  ;;  %548 = vmatpush.bf16.msrb.mxu3 %v2754_v61  ;;  %v2811_v60 = vor.u32 %v2432_v52, %v2240_v51  ;;  %v2216_v62 = vld [vmem:[#allocation4] sm:$0xf]  ;;  %v2427_v63 = vld [vmem:[#allocation4 + $0xc] sm:$0xf0]  ;;  %v2425_v0 = vld [vmem:[#allocation4 + $0x4] sm:$0xf]  ;;  %v2814_v1 = vor.u32 %v2430_v53, %v2242_v54 }
  0x35   :  { %v2218_v2 = vld [vmem:[#allocation4 + $0x10] sm:$0xf0]  ;;  %v2224_v6 = vld [vmem:[#allocation4 + $0x8] sm:$0xf]  ;;  %v2428_v7 = vld [vmem:[#allocation4 + $0x14] sm:$0xf0]  ;;  %v2817_v11 = vor.u32 %v2427_v63, %v2216_v62 }
  0x36   :  { %510 = vmatpush.bf16.msrb.mxu0 %v2757_v3  ;;  %v2426_v8 = vld [vmem:[#allocation4 + $0xc] sm:$0xf]  ;;  %v2226_v10 = vld [vmem:[#allocation4 + $0x18] sm:$0xf0]  ;;  %v2821_v12 = vor.u32 %v2425_v0, %v2218_v2  ;;  %v2823_v13 = vor.u32 %v2428_v7, %v2224_v6  ;;  %v2698_v18 = vmov 0  }
  0x37   :  { %523 = vmatpush.bf16.msrb.mxu1 %v2761_v4  ;;  %v2826_v14 = vor.u32 %v2426_v8, %v2226_v10  ;;  %v84_v22 = vld [vmem:[%s3381_s3] sm:$0xf] }
  0x38   :  { %536 = vmatpush.bf16.msrb.mxu2 %v2763_v5  ;;  %549 = vmatpush.bf16.msrb.mxu3 %v2766_v9  ;;  %v86_v24 = vperm.slane %v84_v22, 0  ;;  %v87_v25 = vperm.slane %v84_v22, 1  ;;  %v88_v35 = vperm.slane %v84_v22, 2  ;;  %v89_v36 = vperm.slane %v84_v22, 3 }
  0x3a   :  { %511 = vmatpush.bf16.msrb.mxu0 %v2769_v15 }
  0x3b   :  { %524 = vmatpush.bf16.msrb.mxu1 %v2773_v16 }
  0x3c   :  { %537 = vmatpush.bf16.msrb.mxu2 %v2775_v17  ;;  %550 = vmatpush.bf16.msrb.mxu3 %v2778_v21 }
  0x3e   :  { %512 = vmatpush.bf16.msrb.mxu0 %v2781_v27 }
  0x3f   :  { %525 = vmatpush.bf16.msrb.mxu1 %v2785_v28 }
  0x40   :  { %538 = vmatpush.bf16.msrb.mxu2 %v2787_v29  ;;  %551 = vmatpush.bf16.msrb.mxu3 %v2790_v33 }
  0x42   :  { %513 = vmatpush.bf16.msrb.mxu0 %v2793_v39 }
  0x43   :  { %526 = vmatpush.bf16.msrb.mxu1 %v2797_v40 }
  0x44   :  { %539 = vmatpush.bf16.msrb.mxu2 %v2799_v41  ;;  %552 = vmatpush.bf16.msrb.mxu3 %v2802_v49 }
  0x46   :  { %514 = vmatpush.bf16.msrb.mxu0 %v2805_v58 }
  0x47   :  { %527 = vmatpush.bf16.msrb.mxu1 %v2809_v59 }
  0x48   :  { %540 = vmatpush.bf16.msrb.mxu2 %v2811_v60  ;;  %553 = vmatpush.bf16.msrb.mxu3 %v2814_v1 }
  0x4a   :  { %515 = vmatpush.bf16.msrb.mxu0 %v2817_v11 }
  0x4b   :  { %528 = vmatpush.bf16.msrb.mxu1 %v2821_v12 }
  0x4c   :  { %541 = vmatpush.bf16.msrb.mxu2 %v2823_v13  ;;  %554 = vmatpush.bf16.msrb.mxu3 %v2826_v14 }
  0x4d   :  { %516 = vmatmul.bf16.vlgmr.msrb.gmra.mxu0 %v2698_v18 }
  0x4e   :  { %648 = vmatpush.bf16.msra.mxu0 %v2736_v42  ;;  %529 = vmatmul.bf16.vlgmr.msrb.gmra.mxu1 %v2698_v18 }
  0x4f   :  { %661 = vmatpush.bf16.msra.mxu1 %v2738_v43  ;;  %542 = vmatmul.bf16.vlgmr.msrb.gmra.mxu2 %v2698_v18 }
  0x50   :  { %555 = vmatmul.bf16.vlgmr.msrb.gmra.mxu3 %v2698_v18  ;;  %674 = vmatpush.bf16.msra.mxu2 %v2740_v44 }
  0x51   :  { %687 = vmatpush.bf16.msra.mxu3 %v2742_v48 }
  0x52   :  { %649 = vmatpush.bf16.msra.mxu0 %v2745_v55 }
  0x53   :  { %662 = vmatpush.bf16.msra.mxu1 %v2749_v56 }
  0x54   :  { %675 = vmatpush.bf16.msra.mxu2 %v2751_v57 }
  0x55   :  { %688 = vmatpush.bf16.msra.mxu3 %v2754_v61 }
  0x56   :  { %650 = vmatpush.bf16.msra.mxu0 %v2757_v3 }
  0x57   :  { %663 = vmatpush.bf16.msra.mxu1 %v2761_v4 }
  0x58   :  { %676 = vmatpush.bf16.msra.mxu2 %v2763_v5 }
  0x59   :  { %689 = vmatpush.bf16.msra.mxu3 %v2766_v9 }
  0x5a   :  { %651 = vmatpush.bf16.msra.mxu0 %v2769_v15 }
  0x5b   :  { %664 = vmatpush.bf16.msra.mxu1 %v2773_v16 }
  0x5c   :  { %677 = vmatpush.bf16.msra.mxu2 %v2775_v17 }
  0x5d   :  { %690 = vmatpush.bf16.msra.mxu3 %v2778_v21 }
  0x5e   :  { %652 = vmatpush.bf16.msra.mxu0 %v2781_v27 }
  0x5f   :  { %665 = vmatpush.bf16.msra.mxu1 %v2785_v28 }
  0x60   :  { %678 = vmatpush.bf16.msra.mxu2 %v2787_v29 }
  0x61   :  { %691 = vmatpush.bf16.msra.mxu3 %v2790_v33 }
  0x62   :  { %653 = vmatpush.bf16.msra.mxu0 %v2793_v39 }
  0x63   :  { %666 = vmatpush.bf16.msra.mxu1 %v2797_v40 }
  0x64   :  { %679 = vmatpush.bf16.msra.mxu2 %v2799_v41 }
  0x65   :  { %692 = vmatpush.bf16.msra.mxu3 %v2802_v49 }
  0x66   :  { %654 = vmatpush.bf16.msra.mxu0 %v2805_v58 }
  0x67   :  { %667 = vmatpush.bf16.msra.mxu1 %v2809_v59 }
  0x68   :  { %680 = vmatpush.bf16.msra.mxu2 %v2811_v60 }
  0x69   :  { %693 = vmatpush.bf16.msra.mxu3 %v2814_v1 }
  0x6a   :  { %655 = vmatpush.bf16.msra.mxu0 %v2817_v11 }
  0x6b   :  { %668 = vmatpush.bf16.msra.mxu1 %v2821_v12 }
  0x6c   :  { %681 = vmatpush.bf16.msra.mxu2 %v2823_v13 }
  0x6d   :  { %694 = vmatpush.bf16.msra.mxu3 %v2826_v14 }
  0x6e   :  { %807 = vmatpush.bf16.msrb.mxu0 %v2736_v42 }
  0x6f   :  { %820 = vmatpush.bf16.msrb.mxu1 %v2738_v43 }
  0x70   :  { %833 = vmatpush.bf16.msrb.mxu2 %v2740_v44 }
  0x71   :  { %846 = vmatpush.bf16.msrb.mxu3 %v2742_v48 }
  0x72   :  { %808 = vmatpush.bf16.msrb.mxu0 %v2745_v55 }
  0x73   :  { %821 = vmatpush.bf16.msrb.mxu1 %v2749_v56 }
  0x74   :  { %834 = vmatpush.bf16.msrb.mxu2 %v2751_v57 }
  0x75   :  { %847 = vmatpush.bf16.msrb.mxu3 %v2754_v61 }
  0x76   :  { %809 = vmatpush.bf16.msrb.mxu0 %v2757_v3 }
  0x77   :  { %822 = vmatpush.bf16.msrb.mxu1 %v2761_v4 }
  0x78   :  { %835 = vmatpush.bf16.msrb.mxu2 %v2763_v5 }
  0x79   :  { %848 = vmatpush.bf16.msrb.mxu3 %v2766_v9 }
  0x7a   :  { %810 = vmatpush.bf16.msrb.mxu0 %v2769_v15 }
  0x7b   :  { %823 = vmatpush.bf16.msrb.mxu1 %v2773_v16 }
  0x7c   :  { %836 = vmatpush.bf16.msrb.mxu2 %v2775_v17 }
  0x7d   :  { %849 = vmatpush.bf16.msrb.mxu3 %v2778_v21 }
  0x7e   :  { %811 = vmatpush.bf16.msrb.mxu0 %v2781_v27 }
  0x7f   :  { %824 = vmatpush.bf16.msrb.mxu1 %v2785_v28 }
  0x80   :  { %837 = vmatpush.bf16.msrb.mxu2 %v2787_v29 }
  0x81   :  { %850 = vmatpush.bf16.msrb.mxu3 %v2790_v33 }
  0x82   :  { %812 = vmatpush.bf16.msrb.mxu0 %v2793_v39 }
  0x83   :  { %825 = vmatpush.bf16.msrb.mxu1 %v2797_v40 }
  0x84   :  { %838 = vmatpush.bf16.msrb.mxu2 %v2799_v41 }
  0x85   :  { %851 = vmatpush.bf16.msrb.mxu3 %v2802_v49 }
  0x86   :  { %813 = vmatpush.bf16.msrb.mxu0 %v2805_v58 }
  0x87   :  { %826 = vmatpush.bf16.msrb.mxu1 %v2809_v59 }
  0x88   :  { %839 = vmatpush.bf16.msrb.mxu2 %v2811_v60 }
  0x89   :  { %852 = vmatpush.bf16.msrb.mxu3 %v2814_v1 }
  0x8a   :  { %814 = vmatpush.bf16.msrb.mxu0 %v2817_v11 }
  0x8b   :  { %827 = vmatpush.bf16.msrb.mxu1 %v2821_v12 }
  0x8c   :  { %840 = vmatpush.bf16.msrb.mxu2 %v2823_v13 }
  0x8d   :  { %853 = vmatpush.bf16.msrb.mxu3 %v2826_v14 }
  0xaa   :  { %v269_v19 = vpop.f32.mrf.mxu0 }
  0xab   :  { %v283_v20 = vpop.f32.mrf.mxu1  ;;  %v2907_v47 = vadd.f32 %v269_v19, %v86_v24 }
  0xac   :  { %v2909_v50 = vadd.f32 %v283_v20, %v87_v25 }
  0xad   :  { %3400 = vst [vmem:[#allocation12_spill] sm:$0xff] %v2907_v47 }
  0xae   :  { %3401 = vst [vmem:[#allocation13_spill] sm:$0xff] %v2909_v50 }
  0xb2   :  { %v297_v23 = vpop.f32.mrf.mxu2  ;;  %v271_v30 = vpop.f32.mrf.mxu0 }
  0xb3   :  { %v285_v31 = vpop.f32.mrf.mxu1  ;;  %v2899_v32 = vadd.f32 %v271_v30, %v86_v24  ;;  %v2915_v2 = vadd.f32 %v297_v23, %v88_v35 }
  0xb4   :  { %v311_v26 = vpop.f32.mrf.mxu3  ;;  %v2901_v34 = vadd.f32 %v285_v31, %v87_v25 }
  0xb5   :  { %3396 = vst [vmem:[#allocation8_spill] sm:$0xff] %v2899_v32  ;;  %v2913_v0 = vadd.f32 %v311_v26, %v89_v36 }
  0xb6   :  { %3397 = vst [vmem:[#allocation9_spill] sm:$0xff] %v2901_v34 }
  0xb7   :  { %3402 = vst [vmem:[#allocation14_spill] sm:$0xff] %v2913_v0 }
  0xb8   :  { %3403 = vst [vmem:[#allocation15_spill] sm:$0xff] %v2915_v2 }
  0xba   :  { %v299_v37 = vpop.f32.mrf.mxu2 }
  0xbb   :  { %v2903_v38 = vadd.f32 %v299_v37, %v88_v35 }
  0xbc   :  { %v313_v45 = vpop.f32.mrf.mxu3 }
  0xbd   :  { %3398 = vst [vmem:[#allocation10_spill] sm:$0xff] %v2903_v38  ;;  %v2905_v46 = vadd.f32 %v313_v45, %v89_v36 }
  0xbf   :  { %3399 = vst [vmem:[#allocation11_spill] sm:$0xff] %v2905_v46 }
  0xca   :  { %v517_v51 = vpop.f32.mrf.mxu0 }
  0xcb   :  { %v560_v52 = vadd.f32 %v517_v51, %v2907_v47  ;;  %v530_v53 = vpop.f32.mrf.mxu1 }
  0xcc   :  { %v561_v54 = vadd.f32 %v530_v53, %v2909_v50 }
  0xcd   :  { %v2342_v62 = vmul.f32 -1.442695, %v560_v52 }
  0xce   :  { %v2343_v63 = vmul.f32 -1.442695, %v561_v54 }
  0xcf   :  { %2462 = vpow2.f32 %v2342_v62 }
  0xd0   :  { %2464 = vpow2.f32 %v2343_v63 }
  0xd2   :  { %v543_v6 = vpop.f32.mrf.mxu2  ;;  %v519_v10 = vpop.f32.mrf.mxu0 }
  0xd3   :  { %v562_v7 = vadd.f32 %v543_v6, %v2915_v2  ;;  %v556_v8 = vpop.f32.mrf.mxu3  ;;  %v532_v19 = vpop.f32.mrf.mxu1 }
  0xd4   :  { %v563_v18 = vadd.f32 %v556_v8, %v2913_v0 }
  0xd5   :  { %v2344_v20 = vmul.f32 -1.442695, %v562_v7  ;;  %v2463_v22 = vpop.eup %2462 }
  0xd6   :  { %v2345_v24 = vmul.f32 -1.442695, %v563_v18  ;;  %v2465_v25 = vpop.eup %2464  ;;  %v576_v30 = vadd.f32 1.0, %v2463_v22 }
  0xd7   :  { %2466 = vpow2.f32 %v2344_v20  ;;  %v577_v26 = vadd.f32 1.0, %v2465_v25 }
  0xd8   :  { %2468 = vpow2.f32 %v2345_v24  ;;  %vm585_vm6 = vweird.f32 %v576_v30 }
  0xd9   :  { %2470 = vrcp.f32 %v576_v30  ;;  %vm600_vm2 = vweird.f32 %v577_v26 }
  0xda   :  { %2472 = vrcp.f32 %v577_v26  ;;  %v545_v23 = vpop.f32.mrf.mxu2 }
  0xdb   :  { %v558_v31 = vpop.f32.mrf.mxu3  ;;  %v604_v23 = vand.u32 2147483647, %v577_v26 }
  0xdc   :  { %v606_v31 = vand.u32 2147483648, %v577_v26 }
  0xdd   :  { %v2467_v35 = vpop.eup %2466  ;;  %vm605_vm10 = vcmp.eq.f32.partialorder %v604_v23, 8.507059e+37 }
  0xde   :  { %v2469_v36 = vpop.eup %2468  ;;  %v578_v37 = vadd.f32 1.0, %v2467_v35 }
  0xdf   :  { %v2471_v45 = vpop.eup %2470  ;;  %v579_v51 = vadd.f32 1.0, %v2469_v36 }
  0xe0   :  { %v2473_v52 = vpop.eup %2472  ;;  %2474 = vrcp.f32 %v578_v37  ;;  %v581_v53 = vmul.f32 %v2471_v45, %v576_v30  ;;  %v621_v20 = vand.u32 2147483648, %v578_v37  ;;  %v619_v25 = vand.u32 2147483647, %v578_v37 }
  0xe1   :  { %v596_v54 = vmul.f32 %v2473_v52, %v577_v26  ;;  %2476 = vrcp.f32 %v579_v51  ;;  %vm601_vm0 = vweird.f32 %v2473_v52  ;;  %vm586_vm3 = vweird.f32 %v2471_v45 }
  0xe2   :  { %v582_v63 = vsub.f32 1.0, %v581_v53  ;;  %vm2919_vm4 = vmor %vm600_vm2, %vm601_vm0  ;;  %vm615_vm5 = vweird.f32 %v578_v37  ;;  %vm620_vm8 = vcmp.eq.f32.partialorder %v619_v25, 8.507059e+37  ;;  %v607_v26 = vor.u32 1.1754944e-38, %v606_v31 }
  0xe3   :  { %v597_v62 = vsub.f32 1.0, %v596_v54  ;;  %vm587_vm9 = vmor %vm585_vm6, %vm586_vm3  ;;  %vm630_vm13 = vweird.f32 %v579_v51 }
  0xe4   :  { %v583_v18 = vmul.f32 %v2471_v45, %v582_v63  ;;  %v622_v63 = vor.u32 1.1754944e-38, %v621_v20 }
  0xe5   :  { %v598_v7 = vmul.f32 %v2473_v52, %v597_v62  ;;  %v591_v62 = vand.u32 2147483648, %v576_v30 }
  0xe6   :  { %v2475_v6 = vpop.eup %2474  ;;  %v584_v36 = vadd.f32 %v2471_v45, %v583_v18 }
  0xe7   :  { %v611_v8 = vmul.f32 %v2475_v6, %v578_v37  ;;  %v2477_v10 = vpop.eup %2476  ;;  %v599_v22 = vadd.f32 %v2473_v52, %v598_v7  ;;  %vm616_vm1 = vweird.f32 %v2475_v6  ;;  %v589_v7 = vand.u32 2147483647, %v576_v30 }
  0xe8   :  { %v626_v35 = vmul.f32 %v2477_v10, %v579_v51  ;;  %vm617_vm7 = vmor %vm615_vm5, %vm616_vm1  ;;  %v588_v38 = vsel %vm587_vm9, %v2471_v45, %v584_v36  ;;  %v592_v32 = vor.u32 1.1754944e-38, %v591_v62  ;;  %vm631_vm12 = vweird.f32 %v2477_v10 }
  0xe9   :  { %v612_v19 = vsub.f32 1.0, %v611_v8  ;;  %v603_v8 = vsel %vm2919_vm4, %v2473_v52, %v599_v22  ;;  %vm590_vm11 = vcmp.eq.f32.partialorder %v589_v7, 8.507059e+37  ;;  %v634_v22 = vand.u32 2147483647, %v579_v51  ;;  %vm632_vm14 = vmor %vm630_vm13, %vm631_vm12 }
  0xea   :  { %v627_v46 = vsub.f32 1.0, %v626_v35  ;;  %v593_v0 = vsel %vm590_vm11, %v592_v32, %v588_v38 }
  0xeb   :  { %v613_v24 = vmul.f32 %v2475_v6, %v612_v19  ;;  %vm635_vm15 = vcmp.eq.f32.partialorder %v634_v22, 8.507059e+37 }
  0xec   :  { %v628_v2 = vmul.f32 %v2477_v10, %v627_v46 }
  0xed   :  { %v614_v54 = vadd.f32 %v2475_v6, %v613_v24  ;;  %v608_v24 = vsel %vm605_vm10, %v607_v26, %v603_v8  ;;  %v3408_v26 = vld [vmem:[#allocation15_spill] sm:$0xff] }
  0xee   :  { %v642_v20 = vmul.f32 0.0, %v608_v24  ;;  %v629_v52 = vadd.f32 %v2477_v10, %v628_v2  ;;  %v3409_v24 = vld [vmem:[#allocation14_spill] sm:$0xff] }
  0xef   :  { %v618_v19 = vsel %vm617_vm7, %v2475_v6, %v614_v54  ;;  %v636_v6 = vand.u32 2147483648, %v579_v51 }
  0xf0   :  { %v623_v18 = vsel %vm620_vm8, %v622_v63, %v618_v19  ;;  %v633_v45 = vsel %vm632_vm14, %v2477_v10, %v629_v52  ;;  %v3407_v10 = vld [vmem:[#allocation13_spill] sm:$0xff] }
  0xf1   :  { %v640_v34 = vmul.f32 2.0, %v623_v18  ;;  %v637_v25 = vor.u32 1.1754944e-38, %v636_v6 }
  0xf3   :  { %v2346_v37 = vadd.f32 -1.0, %v640_v34  ;;  %v638_v31 = vsel %vm635_vm15, %v637_v25, %v633_v45 }
  0xf5   :  { %v643_v30 = vmul.f32 %v2346_v37, %v593_v0 }
  0xf7   :  { %v2925_v50 = vadd.f32 %v643_v30, %v642_v20 }
  0xf9   :  { %2478 = vtanh.f32 %v2925_v50 }
  0xff   :  { %v2479_v23 = vpop.eup %2478 }
 0x100   :  { %v2928_v34 = vmul.f32 %v2479_v23, %v638_v31 }
 0x102   :  { %3406 = vst [vmem:[#allocation16_spill] sm:$0xff] %v2928_v34  ;;  %v647_v32 = vpack.c.bf16 %v2928_v34, %v2928_v34 }
 0x104   :  { %656 = vmatmul.bf16.vlgmr.msra.gmra.mxu0 %v647_v32  ;;  %669 = vmatmul.bf16.vlgmr.msra.gmra.mxu1 %v647_v32 }
 0x105   :  { %682 = vmatmul.bf16.vlgmr.msra.gmra.mxu2 %v647_v32  ;;  %695 = vmatmul.bf16.vlgmr.msra.gmra.mxu3 %v647_v32 }
 0x106   :  { %965 = vmatpush.bf16.msra.mxu0 %v2736_v42  ;;  %978 = vmatpush.bf16.msra.mxu1 %v2738_v43 }
 0x107   :  { %991 = vmatpush.bf16.msra.mxu2 %v2740_v44  ;;  %1004 = vmatpush.bf16.msra.mxu3 %v2742_v48 }
 0x10a   :  { %966 = vmatpush.bf16.msra.mxu0 %v2745_v55  ;;  %979 = vmatpush.bf16.msra.mxu1 %v2749_v56 }
 0x10b   :  { %992 = vmatpush.bf16.msra.mxu2 %v2751_v57  ;;  %1005 = vmatpush.bf16.msra.mxu3 %v2754_v61 }
 0x10e   :  { %967 = vmatpush.bf16.msra.mxu0 %v2757_v3  ;;  %980 = vmatpush.bf16.msra.mxu1 %v2761_v4 }
 0x10f   :  { %993 = vmatpush.bf16.msra.mxu2 %v2763_v5  ;;  %1006 = vmatpush.bf16.msra.mxu3 %v2766_v9 }
 0x112   :  { %968 = vmatpush.bf16.msra.mxu0 %v2769_v15  ;;  %981 = vmatpush.bf16.msra.mxu1 %v2773_v16 }
 0x113   :  { %994 = vmatpush.bf16.msra.mxu2 %v2775_v17  ;;  %1007 = vmatpush.bf16.msra.mxu3 %v2778_v21 }
 0x116   :  { %969 = vmatpush.bf16.msra.mxu0 %v2781_v27  ;;  %982 = vmatpush.bf16.msra.mxu1 %v2785_v28 }
 0x117   :  { %995 = vmatpush.bf16.msra.mxu2 %v2787_v29  ;;  %1008 = vmatpush.bf16.msra.mxu3 %v2790_v33 }
 0x11a   :  { %970 = vmatpush.bf16.msra.mxu0 %v2793_v39  ;;  %983 = vmatpush.bf16.msra.mxu1 %v2797_v40 }
 0x11b   :  { %996 = vmatpush.bf16.msra.mxu2 %v2799_v41  ;;  %1009 = vmatpush.bf16.msra.mxu3 %v2802_v49 }
 0x11e   :  { %971 = vmatpush.bf16.msra.mxu0 %v2805_v58  ;;  %984 = vmatpush.bf16.msra.mxu1 %v2809_v59 }
 0x11f   :  { %997 = vmatpush.bf16.msra.mxu2 %v2811_v60  ;;  %1010 = vmatpush.bf16.msra.mxu3 %v2814_v1 }
 0x122   :  { %972 = vmatpush.bf16.msra.mxu0 %v2817_v11  ;;  %985 = vmatpush.bf16.msra.mxu1 %v2821_v12 }
 0x123   :  { %998 = vmatpush.bf16.msra.mxu2 %v2823_v13  ;;  %1011 = vmatpush.bf16.msra.mxu3 %v2826_v14 }
 0x181   :  { %v657_v38 = vpop.f32.mrf.mxu0  ;;  %v670_v46 = vpop.f32.mrf.mxu1 }
 0x182   :  { %v704_v0 = vrot.slane %v657_v38, 7  ;;  %v705_v2 = vrot.slane %v670_v46, 7 }
 0x184   :  { %v712_v51 = vadd.f32 %v704_v0, %v2907_v47  ;;  %v713_v35 = vadd.f32 %v705_v2, %v3407_v10 }
 0x186   :  { %v2347_v36 = vmul.f32 -1.442695, %v712_v51  ;;  %v2348_v53 = vmul.f32 -1.442695, %v713_v35 }
 0x188   :  { %2480 = vpow2.f32 %v2347_v36  ;;  %v683_v54 = vpop.f32.mrf.mxu2  ;;  %v696_v62 = vpop.f32.mrf.mxu3 }
 0x189   :  { %2482 = vpow2.f32 %v2348_v53  ;;  %v706_v63 = vrot.slane %v683_v54, 7  ;;  %v707_v7 = vrot.slane %v696_v62, 7  ;;  %v659_v8 = vpop.f32.mrf.mxu0  ;;  %v672_v19 = vpop.f32.mrf.mxu1 }
 0x18b   :  { %v714_v18 = vadd.f32 %v706_v63, %v3408_v26  ;;  %v715_v37 = vadd.f32 %v707_v7, %v3409_v24 }
 0x18d   :  { %v2349_v20 = vmul.f32 -1.442695, %v714_v18  ;;  %v2350_v30 = vmul.f32 -1.442695, %v715_v37 }
 0x18e   :  { %v2481_v52 = vpop.eup %2480 }
 0x18f   :  { %v2483_v6 = vpop.eup %2482  ;;  %v728_v22 = vadd.f32 1.0, %v2481_v52  ;;  %2484 = vpow2.f32 %v2349_v20 }
 0x190   :  { %v729_v45 = vadd.f32 1.0, %v2483_v6  ;;  %2486 = vpow2.f32 %v2350_v30  ;;  %v685_v25 = vpop.f32.mrf.mxu2  ;;  %v698_v23 = vpop.f32.mrf.mxu3 }
 0x191   :  { %2488 = vrcp.f32 %v728_v22  ;;  %vm737_vm6 = vweird.f32 %v728_v22 }
 0x192   :  { %2490 = vrcp.f32 %v729_v45  ;;  %vm752_vm2 = vweird.f32 %v729_v45  ;;  %v756_v52 = vand.u32 2147483647, %v729_v45  ;;  %v758_v6 = vand.u32 2147483648, %v729_v45 }
 0x194   :  { %vm757_vm10 = vcmp.eq.f32.partialorder %v756_v52, 8.507059e+37 }
 0x195   :  { %v2485_v31 = vpop.eup %2484 }
 0x196   :  { %v2487_v32 = vpop.eup %2486  ;;  %v730_v38 = vadd.f32 1.0, %v2485_v31 }
 0x197   :  { %v2489_v46 = vpop.eup %2488  ;;  %v2968_v0 = vadd.f32 1.0, %v2487_v32 }
 0x198   :  { %v2491_v2 = vpop.eup %2490  ;;  %2492 = vrcp.f32 %v730_v38  ;;  %v733_v51 = vmul.f32 %v2489_v46, %v728_v22  ;;  %v773_v18 = vand.u32 2147483648, %v730_v38  ;;  %v771_v30 = vand.u32 2147483647, %v730_v38 }
 0x199   :  { %v748_v35 = vmul.f32 %v2491_v2, %v729_v45  ;;  %2494 = vrcp.f32 %v2968_v0  ;;  %vm753_vm0 = vweird.f32 %v2491_v2  ;;  %vm738_vm3 = vweird.f32 %v2489_v46 }
 0x19a   :  { %v734_v53 = vsub.f32 1.0, %v733_v51  ;;  %vm2972_vm4 = vmor %vm752_vm2, %vm753_vm0  ;;  %vm767_vm5 = vweird.f32 %v730_v38  ;;  %v743_v51 = vand.u32 2147483648, %v728_v22  ;;  %vm772_vm8 = vcmp.eq.f32.partialorder %v771_v30, 8.507059e+37 }
 0x19b   :  { %v749_v36 = vsub.f32 1.0, %v748_v35  ;;  %v774_v35 = vor.u32 1.1754944e-38, %v773_v18  ;;  %vm739_vm9 = vmor %vm737_vm6, %vm738_vm3  ;;  %v759_v45 = vor.u32 1.1754944e-38, %v758_v6  ;;  %vm782_vm13 = vweird.f32 %v2968_v0 }
 0x19c   :  { %v735_v8 = vmul.f32 %v2489_v46, %v734_v53  ;;  %v744_v24 = vor.u32 1.1754944e-38, %v743_v51 }
 0x19d   :  { %v750_v62 = vmul.f32 %v2491_v2, %v749_v36  ;;  %v741_v36 = vand.u32 2147483647, %v728_v22 }
 0x19e   :  { %v2493_v54 = vpop.eup %2492  ;;  %v736_v23 = vadd.f32 %v2489_v46, %v735_v8 }
 0x19f   :  { %v763_v63 = vmul.f32 %v2493_v54, %v730_v38  ;;  %v2495_v7 = vpop.eup %2494  ;;  %v751_v37 = vadd.f32 %v2491_v2, %v750_v62  ;;  %vm768_vm1 = vweird.f32 %v2493_v54  ;;  %v795_v38 = vrot.slane %v2925_v50, 7 }
 0x1a0   :  { %v778_v25 = vmul.f32 %v2495_v7, %v2968_v0  ;;  %vm769_vm7 = vmor %vm767_vm5, %vm768_vm1  ;;  %vm742_vm11 = vcmp.eq.f32.partialorder %v741_v36, 8.507059e+37  ;;  %vm783_vm12 = vweird.f32 %v2495_v7 }
 0x1a1   :  { %v764_v19 = vsub.f32 1.0, %v763_v63  ;;  %v755_v53 = vsel %vm2972_vm4, %v2491_v2, %v751_v37  ;;  %v788_v37 = vand.u32 2147483648, %v2968_v0  ;;  %vm784_vm14 = vmor %vm782_vm13, %vm783_vm12 }
 0x1a2   :  { %v779_v8 = vsub.f32 1.0, %v778_v25 }
 0x1a3   :  { %v765_v20 = vmul.f32 %v2493_v54, %v764_v19  ;;  %v740_v19 = vsel %vm739_vm9, %v2489_v46, %v736_v23  ;;  %v786_v46 = vand.u32 2147483647, %v2968_v0  ;;  %v789_v30 = vor.u32 1.1754944e-38, %v788_v37 }
 0x1a4   :  { %v745_v18 = vsel %vm742_vm11, %v744_v24, %v740_v19  ;;  %v780_v22 = vmul.f32 %v2495_v7, %v779_v8 }
 0x1a5   :  { %v766_v32 = vadd.f32 %v2493_v54, %v765_v20  ;;  %v760_v20 = vsel %vm757_vm10, %v759_v45, %v755_v53  ;;  %vm787_vm15 = vcmp.eq.f32.partialorder %v786_v46, 8.507059e+37 }
 0x1a6   :  { %v797_v10 = vmul.f32 %v795_v38, %v760_v20  ;;  %v3413_v20 = vld [vmem:[#allocation15_spill] sm:$0xff] }
 0x1a7   :  { %v770_v62 = vsel %vm769_vm7, %v2493_v54, %v766_v32  ;;  %v781_v54 = vadd.f32 %v2495_v7, %v780_v22  ;;  %v3412_v32 = vld [vmem:[#allocation13_spill] sm:$0xff] }
 0x1a8   :  { %v775_v63 = vsel %vm772_vm8, %v774_v35, %v770_v62 }
 0x1a9   :  { %v792_v34 = vmul.f32 2.0, %v775_v63  ;;  %v785_v50 = vsel %vm784_vm14, %v2495_v7, %v781_v54 }
 0x1aa   :  { %v790_v24 = vsel %vm787_vm15, %v789_v30, %v785_v50  ;;  %vm2058_vm15 = vcmask 1040384  }
 0x1ab   :  { %v2351_v26 = vadd.f32 -1.0, %v792_v34 }
 0x1ad   :  { %v798_v31 = vmul.f32 %v2351_v26, %v745_v18  ;;  %v3414_v18 = vld [vmem:[#allocation14_spill] sm:$0xff] }
 0x1af   :  { %v2979_v2 = vadd.f32 %v798_v31, %v797_v10 }
 0x1b1   :  { %2496 = vtanh.f32 %v2979_v2 }
 0x1b7   :  { %v2497_v34 = vpop.eup %2496 }
 0x1b8   :  { %v2985_v52 = vmul.f32 %v2497_v34, %v790_v24 }
 0x1ba   :  { %v802_v10 = vpack.c.bf16 %v2985_v52, %v2985_v52 }
 0x1bc   :  { %v804_v26 = vshrl.u32 %v802_v10, 16 }
 0x1be   :  { %815 = vmatmul.bf16.vlgmr.msrb.gmra.mxu0 %v804_v26  ;;  %828 = vmatmul.bf16.vlgmr.msrb.gmra.mxu1 %v804_v26 }
 0x1bf   :  { %841 = vmatmul.bf16.vlgmr.msrb.gmra.mxu2 %v804_v26  ;;  %854 = vmatmul.bf16.vlgmr.msrb.gmra.mxu3 %v804_v26 }
 0x1c0   :  { %1125 = vmatpush.bf16.msrb.mxu0 %v2736_v42  ;;  %1138 = vmatpush.bf16.msrb.mxu1 %v2738_v43 }
 0x1c1   :  { %1151 = vmatpush.bf16.msrb.mxu2 %v2740_v44  ;;  %1164 = vmatpush.bf16.msrb.mxu3 %v2742_v48 }
 0x1c4   :  { %1126 = vmatpush.bf16.msrb.mxu0 %v2745_v55  ;;  %1139 = vmatpush.bf16.msrb.mxu1 %v2749_v56 }
 0x1c5   :  { %1152 = vmatpush.bf16.msrb.mxu2 %v2751_v57  ;;  %1165 = vmatpush.bf16.msrb.mxu3 %v2754_v61 }
 0x1c8   :  { %1127 = vmatpush.bf16.msrb.mxu0 %v2757_v3  ;;  %1140 = vmatpush.bf16.msrb.mxu1 %v2761_v4 }
 0x1c9   :  { %1153 = vmatpush.bf16.msrb.mxu2 %v2763_v5  ;;  %1166 = vmatpush.bf16.msrb.mxu3 %v2766_v9 }
 0x1cc   :  { %1128 = vmatpush.bf16.msrb.mxu0 %v2769_v15  ;;  %1141 = vmatpush.bf16.msrb.mxu1 %v2773_v16 }
 0x1cd   :  { %1154 = vmatpush.bf16.msrb.mxu2 %v2775_v17  ;;  %1167 = vmatpush.bf16.msrb.mxu3 %v2778_v21 }
 0x1d0   :  { %1129 = vmatpush.bf16.msrb.mxu0 %v2781_v27  ;;  %1142 = vmatpush.bf16.msrb.mxu1 %v2785_v28 }
 0x1d1   :  { %1155 = vmatpush.bf16.msrb.mxu2 %v2787_v29  ;;  %1168 = vmatpush.bf16.msrb.mxu3 %v2790_v33 }
 0x1d4   :  { %1130 = vmatpush.bf16.msrb.mxu0 %v2793_v39  ;;  %1143 = vmatpush.bf16.msrb.mxu1 %v2797_v40 }
 0x1d5   :  { %1156 = vmatpush.bf16.msrb.mxu2 %v2799_v41  ;;  %1169 = vmatpush.bf16.msrb.mxu3 %v2802_v49 }
 0x1d8   :  { %1131 = vmatpush.bf16.msrb.mxu0 %v2805_v58  ;;  %1144 = vmatpush.bf16.msrb.mxu1 %v2809_v59 }
 0x1d9   :  { %1157 = vmatpush.bf16.msrb.mxu2 %v2811_v60  ;;  %1170 = vmatpush.bf16.msrb.mxu3 %v2814_v1 }
 0x1dc   :  { %1132 = vmatpush.bf16.msrb.mxu0 %v2817_v11  ;;  %1145 = vmatpush.bf16.msrb.mxu1 %v2821_v12 }
 0x1dd   :  { %1158 = vmatpush.bf16.msrb.mxu2 %v2823_v13  ;;  %1171 = vmatpush.bf16.msrb.mxu3 %v2826_v14 }
 0x23b   :  { %v816_v0 = vpop.f32.mrf.mxu0  ;;  %v829_v7 = vpop.f32.mrf.mxu1 }
 0x23c   :  { %v863_v6 = vrot.slane %v816_v0, 6  ;;  %v864_v25 = vrot.slane %v829_v7, 6 }
 0x23e   :  { %v871_v23 = vadd.f32 %v863_v6, %v2907_v47  ;;  %v872_v51 = vadd.f32 %v864_v25, %v3412_v32 }
 0x240   :  { %v2352_v35 = vmul.f32 -1.442695, %v871_v23  ;;  %v2353_v36 = vmul.f32 -1.442695, %v872_v51 }
 0x242   :  { %2498 = vpow2.f32 %v2352_v35  ;;  %v842_v53 = vpop.f32.mrf.mxu2  ;;  %v855_v62 = vpop.f32.mrf.mxu3 }
 0x243   :  { %2500 = vpow2.f32 %v2353_v36  ;;  %v865_v45 = vrot.slane %v842_v53, 6  ;;  %v866_v63 = vrot.slane %v855_v62, 6  ;;  %v818_v8 = vpop.f32.mrf.mxu0  ;;  %v831_v19 = vpop.f32.mrf.mxu1 }
 0x245   :  { %v873_v38 = vadd.f32 %v865_v45, %v3413_v20  ;;  %v874_v22 = vadd.f32 %v866_v63, %v3414_v18 }
 0x247   :  { %v2354_v31 = vmul.f32 -1.442695, %v873_v38  ;;  %v2355_v54 = vmul.f32 -1.442695, %v874_v22 }
 0x248   :  { %v2499_v37 = vpop.eup %2498 }
 0x249   :  { %v2501_v46 = vpop.eup %2500  ;;  %v887_v50 = vadd.f32 1.0, %v2499_v37  ;;  %2502 = vpow2.f32 %v2354_v31 }
 0x24a   :  { %v888_v30 = vadd.f32 1.0, %v2501_v46  ;;  %2504 = vpow2.f32 %v2355_v54  ;;  %v844_v34 = vpop.f32.mrf.mxu2  ;;  %v857_v24 = vpop.f32.mrf.mxu3 }
 0x24b   :  { %2506 = vrcp.f32 %v887_v50  ;;  %vm896_vm6 = vweird.f32 %v887_v50 }
 0x24c   :  { %2508 = vrcp.f32 %v888_v30  ;;  %vm911_vm2 = vweird.f32 %v888_v30  ;;  %v915_v37 = vand.u32 2147483647, %v888_v30  ;;  %v917_v46 = vand.u32 2147483648, %v888_v30 }
 0x24e   :  { %vm916_vm10 = vcmp.eq.f32.partialorder %v915_v37, 8.507059e+37 }
 0x24f   :  { %v2503_v10 = vpop.eup %2502 }
 0x250   :  { %v2505_v26 = vpop.eup %2504  ;;  %v889_v0 = vadd.f32 1.0, %v2503_v10 }
 0x251   :  { %v2507_v7 = vpop.eup %2506  ;;  %v3025_v6 = vadd.f32 1.0, %v2505_v26 }
 0x252   :  { %v2509_v25 = vpop.eup %2508  ;;  %2510 = vrcp.f32 %v889_v0  ;;  %v892_v23 = vmul.f32 %v2507_v7, %v887_v50  ;;  %v932_v38 = vand.u32 2147483648, %v889_v0  ;;  %v930_v54 = vand.u32 2147483647, %v889_v0 }
 0x253   :  { %v907_v51 = vmul.f32 %v2509_v25, %v888_v30  ;;  %2512 = vrcp.f32 %v3025_v6  ;;  %vm912_vm0 = vweird.f32 %v2509_v25  ;;  %vm897_vm3 = vweird.f32 %v2507_v7 }
 0x254   :  { %v893_v36 = vsub.f32 1.0, %v892_v23  ;;  %vm3029_vm4 = vmor %vm911_vm2, %vm912_vm0  ;;  %vm926_vm5 = vweird.f32 %v889_v0  ;;  %v902_v23 = vand.u32 2147483648, %v887_v50  ;;  %vm931_vm8 = vcmp.eq.f32.partialorder %v930_v54, 8.507059e+37 }
 0x255   :  { %v908_v35 = vsub.f32 1.0, %v907_v51  ;;  %v933_v51 = vor.u32 1.1754944e-38, %v932_v38  ;;  %vm898_vm9 = vmor %vm896_vm6, %vm897_vm3  ;;  %v918_v30 = vor.u32 1.1754944e-38, %v917_v46  ;;  %vm941_vm13 = vweird.f32 %v3025_v6 }
 0x256   :  { %v894_v8 = vmul.f32 %v2507_v7, %v893_v36  ;;  %v903_v20 = vor.u32 1.1754944e-38, %v902_v23  ;;  %v3418_v23 = vld [vmem:[#allocation12_spill] sm:$0xff] }
 0x257   :  { %v909_v62 = vmul.f32 %v2509_v25, %v908_v35  ;;  %v900_v35 = vand.u32 2147483647, %v887_v50 }
 0x258   :  { %v2511_v53 = vpop.eup %2510  ;;  %v895_v24 = vadd.f32 %v2507_v7, %v894_v8 }
 0x259   :  { %v922_v45 = vmul.f32 %v2511_v53, %v889_v0  ;;  %v2513_v63 = vpop.eup %2512  ;;  %v910_v22 = vadd.f32 %v2509_v25, %v909_v62  ;;  %vm927_vm1 = vweird.f32 %v2511_v53  ;;  %v954_v0 = vrot.slane %v2979_v2, 7 }
 0x25a   :  { %v937_v34 = vmul.f32 %v2513_v63, %v3025_v6  ;;  %vm928_vm7 = vmor %vm926_vm5, %vm927_vm1  ;;  %vm901_vm11 = vcmp.eq.f32.partialorder %v900_v35, 8.507059e+37  ;;  %vm942_vm12 = vweird.f32 %v2513_v63  ;;  %vm2060_vm1 = vcmask 1041408   ;;  %v3419_v35 = vld [vmem:[#allocation13_spill] sm:$0xff] }
 0x25b   :  { %v923_v19 = vsub.f32 1.0, %v922_v45  ;;  %v914_v36 = vsel %vm3029_vm4, %v2509_v25, %v910_v22  ;;  %v947_v22 = vand.u32 2147483648, %v3025_v6  ;;  %vm943_vm14 = vmor %vm941_vm13, %vm942_vm12 }
 0x25c   :  { %v938_v8 = vsub.f32 1.0, %v937_v34 }
 0x25d   :  { %v924_v31 = vmul.f32 %v2511_v53, %v923_v19  ;;  %v899_v19 = vsel %vm898_vm9, %v2507_v7, %v895_v24  ;;  %v945_v7 = vand.u32 2147483647, %v3025_v6  ;;  %v948_v54 = vor.u32 1.1754944e-38, %v947_v22 }
 0x25e   :  { %v904_v38 = vsel %vm901_vm11, %v903_v20, %v899_v19  ;;  %v939_v50 = vmul.f32 %v2513_v63, %v938_v8 }
 0x25f   :  { %v925_v26 = vadd.f32 %v2511_v53, %v924_v31  ;;  %v919_v31 = vsel %vm916_vm10, %v918_v30, %v914_v36  ;;  %vm946_vm0 = vcmp.eq.f32.partialorder %v945_v7, 8.507059e+37 }
 0x260   :  { %v956_v47 = vmul.f32 %v954_v0, %v919_v31 }
 0x261   :  { %v929_v62 = vsel %vm928_vm7, %v2511_v53, %v925_v26  ;;  %v940_v53 = vadd.f32 %v2513_v63, %v939_v50  ;;  %v3420_v50 = vld [vmem:[#allocation15_spill] sm:$0xff] }
 0x262   :  { %v934_v45 = vsel %vm931_vm8, %v933_v51, %v929_v62 }
 0x263   :  { %v951_v18 = vmul.f32 2.0, %v934_v45  ;;  %v944_v2 = vsel %vm943_vm14, %v2513_v63, %v940_v53  ;;  %v3421_v53 = vld [vmem:[#allocation14_spill] sm:$0xff] }
 0x265   :  { %v2356_v32 = vadd.f32 -1.0, %v951_v18  ;;  %v949_v18 = vsel %vm946_vm0, %v948_v54, %v944_v2 }
 0x267   :  { %v957_v10 = vmul.f32 %v2356_v32, %v904_v38  ;;  %v3417_v32 = vld [vmem:[#allocation16_spill] sm:$0xff] }
 0x268   :  { %v2059_v37 = vsel %vm2058_vm15, %v3417_v32, %v2985_v52 }
 0x269   :  { %v3036_v25 = vadd.f32 %v957_v10, %v956_v47 }
 0x26b   :  { %2514 = vtanh.f32 %v3036_v25 }
 0x271   :  { %v2515_v20 = vpop.eup %2514 }
 0x272   :  { %v960_v47 = vmul.f32 %v2515_v20, %v949_v18 }
 0x274   :  { %v961_v46 = vpack.c.bf16 %v960_v47, %v960_v47  ;;  %v3046_v34 = vsel %vm2060_vm1, %v2059_v37, %v960_v47 }
 0x276   :  { %v963_v24 = vrot.slane %v961_v46, 1 }
 0x278   :  { %973 = vmatmul.bf16.vlgmr.msra.gmra.mxu0 %v963_v24  ;;  %986 = vmatmul.bf16.vlgmr.msra.gmra.mxu1 %v963_v24 }
 0x279   :  { %999 = vmatmul.bf16.vlgmr.msra.gmra.mxu2 %v963_v24  ;;  %1012 = vmatmul.bf16.vlgmr.msra.gmra.mxu3 %v963_v24 }
 0x27a   :  { %1283 = vmatpush.bf16.msra.mxu0 %v2736_v42  ;;  %1296 = vmatpush.bf16.msra.mxu1 %v2738_v43 }
 0x27b   :  { %1309 = vmatpush.bf16.msra.mxu2 %v2740_v44  ;;  %1322 = vmatpush.bf16.msra.mxu3 %v2742_v48 }
 0x27e   :  { %1284 = vmatpush.bf16.msra.mxu0 %v2745_v55  ;;  %1297 = vmatpush.bf16.msra.mxu1 %v2749_v56 }
 0x27f   :  { %1310 = vmatpush.bf16.msra.mxu2 %v2751_v57  ;;  %1323 = vmatpush.bf16.msra.mxu3 %v2754_v61 }
 0x282   :  { %1285 = vmatpush.bf16.msra.mxu0 %v2757_v3  ;;  %1298 = vmatpush.bf16.msra.mxu1 %v2761_v4 }
 0x283   :  { %1311 = vmatpush.bf16.msra.mxu2 %v2763_v5  ;;  %1324 = vmatpush.bf16.msra.mxu3 %v2766_v9 }
 0x286   :  { %1286 = vmatpush.bf16.msra.mxu0 %v2769_v15  ;;  %1299 = vmatpush.bf16.msra.mxu1 %v2773_v16 }
 0x287   :  { %1312 = vmatpush.bf16.msra.mxu2 %v2775_v17  ;;  %1325 = vmatpush.bf16.msra.mxu3 %v2778_v21 }
 0x28a   :  { %1287 = vmatpush.bf16.msra.mxu0 %v2781_v27  ;;  %1300 = vmatpush.bf16.msra.mxu1 %v2785_v28 }
 0x28b   :  { %1313 = vmatpush.bf16.msra.mxu2 %v2787_v29  ;;  %1326 = vmatpush.bf16.msra.mxu3 %v2790_v33 }
 0x28e   :  { %1288 = vmatpush.bf16.msra.mxu0 %v2793_v39  ;;  %1301 = vmatpush.bf16.msra.mxu1 %v2797_v40 }
 0x28f   :  { %1314 = vmatpush.bf16.msra.mxu2 %v2799_v41  ;;  %1327 = vmatpush.bf16.msra.mxu3 %v2802_v49 }
 0x292   :  { %1289 = vmatpush.bf16.msra.mxu0 %v2805_v58  ;;  %1302 = vmatpush.bf16.msra.mxu1 %v2809_v59 }
 0x293   :  { %1315 = vmatpush.bf16.msra.mxu2 %v2811_v60  ;;  %1328 = vmatpush.bf16.msra.mxu3 %v2814_v1 }
 0x296   :  { %1290 = vmatpush.bf16.msra.mxu0 %v2817_v11  ;;  %1303 = vmatpush.bf16.msra.mxu1 %v2821_v12 }
 0x297   :  { %1316 = vmatpush.bf16.msra.mxu2 %v2823_v13  ;;  %1329 = vmatpush.bf16.msra.mxu3 %v2826_v14 }
 0x2f5   :  { %v974_v52 = vpop.f32.mrf.mxu0  ;;  %v987_v6 = vpop.f32.mrf.mxu1 }
 0x2f6   :  { %v1021_v63 = vrot.slane %v974_v52, 5  ;;  %v1022_v26 = vrot.slane %v987_v6, 5 }
 0x2f8   :  { %v1029_v51 = vadd.f32 %v1021_v63, %v3418_v23  ;;  %v1030_v36 = vadd.f32 %v1022_v26, %v3419_v35 }
 0x2fa   :  { %v2357_v62 = vmul.f32 -1.442695, %v1029_v51  ;;  %v2358_v30 = vmul.f32 -1.442695, %v1030_v36 }
 0x2fc   :  { %2516 = vpow2.f32 %v2357_v62  ;;  %v1000_v45 = vpop.f32.mrf.mxu2  ;;  %v1013_v8 = vpop.f32.mrf.mxu3 }
 0x2fd   :  { %2518 = vpow2.f32 %v2358_v30  ;;  %v1023_v19 = vrot.slane %v1000_v45, 5  ;;  %v1024_v31 = vrot.slane %v1013_v8, 5  ;;  %v976_v0 = vpop.f32.mrf.mxu0  ;;  %v989_v38 = vpop.f32.mrf.mxu1 }
 0x2ff   :  { %v1031_v10 = vadd.f32 %v1023_v19, %v3420_v50  ;;  %v1032_v22 = vadd.f32 %v1024_v31, %v3421_v53 }
 0x301   :  { %v2359_v7 = vmul.f32 -1.442695, %v1031_v10  ;;  %v2360_v2 = vmul.f32 -1.442695, %v1032_v22 }
 0x302   :  { %v2517_v54 = vpop.eup %2516 }
 0x303   :  { %v2519_v20 = vpop.eup %2518  ;;  %v1045_v18 = vadd.f32 1.0, %v2517_v54  ;;  %2520 = vpow2.f32 %v2359_v7 }
 0x304   :  { %v1046_v47 = vadd.f32 1.0, %v2519_v20  ;;  %2522 = vpow2.f32 %v2360_v2  ;;  %v1002_v32 = vpop.f32.mrf.mxu2  ;;  %v1015_v37 = vpop.f32.mrf.mxu3 }
 0x305   :  { %2524 = vrcp.f32 %v1045_v18  ;;  %vm1054_vm8 = vweird.f32 %v1045_v18 }
 0x306   :  { %2526 = vrcp.f32 %v1046_v47  ;;  %vm1069_vm4 = vweird.f32 %v1046_v47  ;;  %v1073_v54 = vand.u32 2147483647, %v1046_v47  ;;  %v1075_v20 = vand.u32 2147483648, %v1046_v47 }
 0x308   :  { %vm1074_vm12 = vcmp.eq.f32.partialorder %v1073_v54, 8.507059e+37 }
 0x309   :  { %v2521_v46 = vpop.eup %2520 }
 0x30a   :  { %v2523_v24 = vpop.eup %2522  ;;  %v1047_v52 = vadd.f32 1.0, %v2521_v46 }
 0x30b   :  { %v2525_v6 = vpop.eup %2524  ;;  %v3084_v63 = vadd.f32 1.0, %v2523_v24 }
 0x30c   :  { %v2527_v26 = vpop.eup %2526  ;;  %2528 = vrcp.f32 %v1047_v52  ;;  %v1050_v51 = vmul.f32 %v2525_v6, %v1045_v18  ;;  %v1090_v10 = vand.u32 2147483648, %v1047_v52  ;;  %v1088_v2 = vand.u32 2147483647, %v1047_v52 }
 0x30d   :  { %v1065_v36 = vmul.f32 %v2527_v26, %v1046_v47  ;;  %2530 = vrcp.f32 %v3084_v63  ;;  %vm1070_vm2 = vweird.f32 %v2527_v26  ;;  %vm1055_vm5 = vweird.f32 %v2525_v6 }
 0x30e   :  { %v1051_v30 = vsub.f32 1.0, %v1050_v51  ;;  %vm3088_vm6 = vmor %vm1069_vm4, %vm1070_vm2  ;;  %vm1084_vm7 = vweird.f32 %v1047_v52  ;;  %v1060_v51 = vand.u32 2147483648, %v1045_v18  ;;  %vm1089_vm10 = vcmp.eq.f32.partialorder %v1088_v2, 8.507059e+37 }
 0x30f   :  { %v1066_v62 = vsub.f32 1.0, %v1065_v36  ;;  %v1091_v36 = vor.u32 1.1754944e-38, %v1090_v10  ;;  %vm1056_vm11 = vmor %vm1054_vm8, %vm1055_vm5  ;;  %v1076_v47 = vor.u32 1.1754944e-38, %v1075_v20  ;;  %vm1099_vm0 = vweird.f32 %v3084_v63 }
 0x310   :  { %v1052_v0 = vmul.f32 %v2525_v6, %v1051_v30  ;;  %v1061_v50 = vor.u32 1.1754944e-38, %v1060_v51  ;;  %vm2062_vm4 = vcmask 1042432  }
 0x311   :  { %v1067_v8 = vmul.f32 %v2527_v26, %v1066_v62  ;;  %v1058_v62 = vand.u32 2147483647, %v1045_v18 }
 0x312   :  { %v2529_v45 = vpop.eup %2528  ;;  %v1053_v37 = vadd.f32 %v2525_v6, %v1052_v0 }
 0x313   :  { %v1080_v19 = vmul.f32 %v2529_v45, %v1047_v52  ;;  %v2531_v31 = vpop.eup %2530  ;;  %v1068_v22 = vadd.f32 %v2527_v26, %v1067_v8  ;;  %vm1085_vm3 = vweird.f32 %v2529_v45  ;;  %v1112_v52 = vrot.slane %v3036_v25, 7 }
 0x314   :  { %v1095_v32 = vmul.f32 %v2531_v31, %v3084_v63  ;;  %vm1086_vm9 = vmor %vm1084_vm7, %vm1085_vm3  ;;  %vm1059_vm13 = vcmp.eq.f32.partialorder %v1058_v62, 8.507059e+37  ;;  %vm1100_vm14 = vweird.f32 %v2531_v31 }
 0x315   :  { %v1081_v38 = vsub.f32 1.0, %v1080_v19  ;;  %v1072_v30 = vsel %vm3088_vm6, %v2527_v26, %v1068_v22  ;;  %v1105_v22 = vand.u32 2147483648, %v3084_v63  ;;  %vm1101_vm2 = vmor %vm1099_vm0, %vm1100_vm14 }
 0x316   :  { %v1096_v0 = vsub.f32 1.0, %v1095_v32 }
 0x317   :  { %v1082_v7 = vmul.f32 %v2529_v45, %v1081_v38  ;;  %v1057_v38 = vsel %vm1056_vm11, %v2525_v6, %v1053_v37  ;;  %v1103_v6 = vand.u32 2147483647, %v3084_v63  ;;  %v1106_v2 = vor.u32 1.1754944e-38, %v1105_v22 }
 0x318   :  { %v1062_v10 = vsel %vm1059_vm13, %v1061_v50, %v1057_v38  ;;  %v1097_v18 = vmul.f32 %v2531_v31, %v1096_v0 }
 0x319   :  { %v1083_v24 = vadd.f32 %v2529_v45, %v1082_v7  ;;  %v1077_v7 = vsel %vm1074_vm12, %v1076_v47, %v1072_v30  ;;  %vm1104_vm3 = vcmp.eq.f32.partialorder %v1103_v6, 8.507059e+37 }
 0x31a   :  { %v1114_v23 = vmul.f32 %v1112_v52, %v1077_v7 }
 0x31b   :  { %v1087_v8 = vsel %vm1086_vm9, %v2529_v45, %v1083_v24  ;;  %v1098_v45 = vadd.f32 %v2531_v31, %v1097_v18  ;;  %v3424_v24 = vld [vmem:[#allocation12_spill] sm:$0xff] }
 0x31c   :  { %v1092_v19 = vsel %vm1089_vm10, %v1091_v36, %v1087_v8  ;;  %v3425_v36 = vld [vmem:[#allocation13_spill] sm:$0xff] }
 0x31d   :  { %v1109_v53 = vmul.f32 2.0, %v1092_v19  ;;  %v1102_v25 = vsel %vm1101_vm2, %v2531_v31, %v1098_v45 }
 0x31f   :  { %v2361_v35 = vadd.f32 -1.0, %v1109_v53  ;;  %v1107_v53 = vsel %vm1104_vm3, %v1106_v2, %v1102_v25 }
 0x321   :  { %v1115_v46 = vmul.f32 %v2361_v35, %v1062_v10  ;;  %v3426_v10 = vld [vmem:[#allocation15_spill] sm:$0xff] }
 0x323   :  { %v3095_v26 = vadd.f32 %v1115_v46, %v1114_v23  ;;  %v3427_v46 = vld [vmem:[#allocation14_spill] sm:$0xff] }
 0x325   :  { %2532 = vtanh.f32 %v3095_v26 }
 0x32b   :  { %v2533_v50 = vpop.eup %2532 }
 0x32c   :  { %v1118_v35 = vmul.f32 %v2533_v50, %v1107_v53 }
 0x32e   :  { %v1119_v23 = vpack.c.bf16 %v1118_v35, %v1118_v35  ;;  %v3102_v54 = vsel %vm2062_vm4, %v3046_v34, %v1118_v35 }
 0x330   :  { %v1121_v20 = vshrl.u32 %v1119_v23, 16 }
 0x332   :  { %v1123_v32 = vrot.slane %v1121_v20, 1 }
 0x334   :  { %1133 = vmatmul.bf16.vlgmr.msrb.gmra.mxu0 %v1123_v32  ;;  %1146 = vmatmul.bf16.vlgmr.msrb.gmra.mxu1 %v1123_v32 }
 0x335   :  { %1159 = vmatmul.bf16.vlgmr.msrb.gmra.mxu2 %v1123_v32  ;;  %1172 = vmatmul.bf16.vlgmr.msrb.gmra.mxu3 %v1123_v32 }
 0x336   :  { %1443 = vmatpush.bf16.msrb.mxu0 %v2736_v42  ;;  %1456 = vmatpush.bf16.msrb.mxu1 %v2738_v43 }
 0x337   :  { %1469 = vmatpush.bf16.msrb.mxu2 %v2740_v44  ;;  %1482 = vmatpush.bf16.msrb.mxu3 %v2742_v48 }
 0x33a   :  { %1444 = vmatpush.bf16.msrb.mxu0 %v2745_v55  ;;  %1457 = vmatpush.bf16.msrb.mxu1 %v2749_v56 }
 0x33b   :  { %1470 = vmatpush.bf16.msrb.mxu2 %v2751_v57  ;;  %1483 = vmatpush.bf16.msrb.mxu3 %v2754_v61 }
 0x33e   :  { %1445 = vmatpush.bf16.msrb.mxu0 %v2757_v3  ;;  %1458 = vmatpush.bf16.msrb.mxu1 %v2761_v4 }
 0x33f   :  { %1471 = vmatpush.bf16.msrb.mxu2 %v2763_v5  ;;  %1484 = vmatpush.bf16.msrb.mxu3 %v2766_v9 }
 0x342   :  { %1446 = vmatpush.bf16.msrb.mxu0 %v2769_v15  ;;  %1459 = vmatpush.bf16.msrb.mxu1 %v2773_v16 }
 0x343   :  { %1472 = vmatpush.bf16.msrb.mxu2 %v2775_v17  ;;  %1485 = vmatpush.bf16.msrb.mxu3 %v2778_v21 }
 0x346   :  { %1447 = vmatpush.bf16.msrb.mxu0 %v2781_v27  ;;  %1460 = vmatpush.bf16.msrb.mxu1 %v2785_v28 }
 0x347   :  { %1473 = vmatpush.bf16.msrb.mxu2 %v2787_v29  ;;  %1486 = vmatpush.bf16.msrb.mxu3 %v2790_v33 }
 0x34a   :  { %1448 = vmatpush.bf16.msrb.mxu0 %v2793_v39  ;;  %1461 = vmatpush.bf16.msrb.mxu1 %v2797_v40 }
 0x34b   :  { %1474 = vmatpush.bf16.msrb.mxu2 %v2799_v41  ;;  %1487 = vmatpush.bf16.msrb.mxu3 %v2802_v49 }
 0x34e   :  { %1449 = vmatpush.bf16.msrb.mxu0 %v2805_v58  ;;  %1462 = vmatpush.bf16.msrb.mxu1 %v2809_v59 }
 0x34f   :  { %1475 = vmatpush.bf16.msrb.mxu2 %v2811_v60  ;;  %1488 = vmatpush.bf16.msrb.mxu3 %v2814_v1 }
 0x352   :  { %1450 = vmatpush.bf16.msrb.mxu0 %v2817_v11  ;;  %1463 = vmatpush.bf16.msrb.mxu1 %v2821_v12 }
 0x353   :  { %1476 = vmatpush.bf16.msrb.mxu2 %v2823_v13  ;;  %1489 = vmatpush.bf16.msrb.mxu3 %v2826_v14 }
 0x3b1   :  { %v1134_v34 = vpop.f32.mrf.mxu0  ;;  %v1147_v63 = vpop.f32.mrf.mxu1 }
 0x3b2   :  { %v1181_v31 = vrot.slane %v1134_v34, 4  ;;  %v1182_v37 = vrot.slane %v1147_v63, 4 }
 0x3b4   :  { %v1189_v51 = vadd.f32 %v1181_v31, %v3424_v24  ;;  %v1190_v62 = vadd.f32 %v1182_v37, %v3425_v36 }
 0x3b6   :  { %v2362_v30 = vmul.f32 -1.442695, %v1189_v51  ;;  %v2363_v8 = vmul.f32 -1.442695, %v1190_v62 }
 0x3b8   :  { %2534 = vpow2.f32 %v2362_v30  ;;  %v1160_v47 = vpop.f32.mrf.mxu2  ;;  %v1173_v19 = vpop.f32.mrf.mxu3 }
 0x3b9   :  { %2536 = vpow2.f32 %v2363_v8  ;;  %v1183_v0 = vrot.slane %v1160_v47, 4  ;;  %v1184_v38 = vrot.slane %v1173_v19, 4  ;;  %v1136_v7 = vpop.f32.mrf.mxu0  ;;  %v1149_v52 = vpop.f32.mrf.mxu1 }
 0x3bb   :  { %v1191_v18 = vadd.f32 %v1183_v0, %v3426_v10  ;;  %v1192_v45 = vadd.f32 %v1184_v38, %v3427_v46 }
 0x3bd   :  { %v2364_v22 = vmul.f32 -1.442695, %v1191_v18  ;;  %v2365_v6 = vmul.f32 -1.442695, %v1192_v45 }
 0x3be   :  { %v2535_v25 = vpop.eup %2534 }
 0x3bf   :  { %v2537_v2 = vpop.eup %2536  ;;  %v1205_v50 = vadd.f32 1.0, %v2535_v25  ;;  %2538 = vpow2.f32 %v2364_v22 }
 0x3c0   :  { %v1206_v53 = vadd.f32 1.0, %v2537_v2  ;;  %2540 = vpow2.f32 %v2365_v6  ;;  %v1162_v35 = vpop.f32.mrf.mxu2  ;;  %v1175_v23 = vpop.f32.mrf.mxu3 }
 0x3c1   :  { %2542 = vrcp.f32 %v1205_v50  ;;  %vm1214_vm11 = vweird.f32 %v1205_v50 }
 0x3c2   :  { %2544 = vrcp.f32 %v1206_v53  ;;  %vm1229_vm7 = vweird.f32 %v1206_v53  ;;  %v1233_v25 = vand.u32 2147483647, %v1206_v53  ;;  %v1235_v2 = vand.u32 2147483648, %v1206_v53 }
 0x3c4   :  { %vm1234_vm0 = vcmp.eq.f32.partialorder %v1233_v25, 8.507059e+37 }
 0x3c5   :  { %v2539_v20 = vpop.eup %2538 }
 0x3c6   :  { %v2541_v32 = vpop.eup %2540  ;;  %v1207_v34 = vadd.f32 1.0, %v2539_v20 }
 0x3c7   :  { %v2543_v63 = vpop.eup %2542  ;;  %v3140_v31 = vadd.f32 1.0, %v2541_v32 }
 0x3c8   :  { %v2545_v37 = vpop.eup %2544  ;;  %2546 = vrcp.f32 %v1207_v34  ;;  %v1210_v51 = vmul.f32 %v2543_v63, %v1205_v50  ;;  %v1250_v18 = vand.u32 2147483648, %v1207_v34  ;;  %v1248_v6 = vand.u32 2147483647, %v1207_v34 }
 0x3c9   :  { %v1225_v62 = vmul.f32 %v2545_v37, %v1206_v53  ;;  %2548 = vrcp.f32 %v3140_v31  ;;  %vm1230_vm5 = vweird.f32 %v2545_v37  ;;  %vm1215_vm8 = vweird.f32 %v2543_v63 }
 0x3ca   :  { %v1211_v8 = vsub.f32 1.0, %v1210_v51  ;;  %vm3144_vm9 = vmor %vm1229_vm7, %vm1230_vm5  ;;  %vm1244_vm10 = vweird.f32 %v1207_v34  ;;  %v1220_v51 = vand.u32 2147483648, %v1205_v50  ;;  %vm1249_vm13 = vcmp.eq.f32.partialorder %v1248_v6, 8.507059e+37 }
 0x3cb   :  { %v1226_v30 = vsub.f32 1.0, %v1225_v62  ;;  %v1251_v62 = vor.u32 1.1754944e-38, %v1250_v18  ;;  %vm1216_vm14 = vmor %vm1214_vm11, %vm1215_vm8  ;;  %v1236_v53 = vor.u32 1.1754944e-38, %v1235_v2  ;;  %vm1259_vm4 = vweird.f32 %v3140_v31 }
 0x3cc   :  { %v1212_v7 = vmul.f32 %v2543_v63, %v1211_v8  ;;  %v1221_v10 = vor.u32 1.1754944e-38, %v1220_v51  ;;  %vm2064_vm7 = vcmask 1043456   ;;  %v3431_v51 = vld [vmem:[#allocation13_spill] sm:$0xff] }
 0x3cd   :  { %v1227_v19 = vmul.f32 %v2545_v37, %v1226_v30  ;;  %v1218_v30 = vand.u32 2147483647, %v1205_v50 }
 0x3ce   :  { %v2547_v47 = vpop.eup %2546  ;;  %v1213_v23 = vadd.f32 %v2543_v63, %v1212_v7 }
 0x3cf   :  { %v1240_v0 = vmul.f32 %v2547_v47, %v1207_v34  ;;  %v2549_v38 = vpop.eup %2548  ;;  %v1228_v45 = vadd.f32 %v2545_v37, %v1227_v19  ;;  %vm1245_vm6 = vweird.f32 %v2547_v47  ;;  %v1272_v34 = vrot.slane %v3095_v26, 7 }
 0x3d0   :  { %v1255_v35 = vmul.f32 %v2549_v38, %v3140_v31  ;;  %vm1246_vm12 = vmor %vm1244_vm10, %vm1245_vm6  ;;  %vm1219_vm2 = vcmp.eq.f32.partialorder %v1218_v30, 8.507059e+37  ;;  %vm1260_vm3 = vweird.f32 %v2549_v38 }
 0x3d1   :  { %v1241_v52 = vsub.f32 1.0, %v1240_v0  ;;  %v1232_v8 = vsel %vm3144_vm9, %v2545_v37, %v1228_v45  ;;  %v1265_v45 = vand.u32 2147483648, %v3140_v31  ;;  %vm1261_vm5 = vmor %vm1259_vm4, %vm1260_vm3 }
 0x3d2   :  { %v1256_v7 = vsub.f32 1.0, %v1255_v35 }
 0x3d3   :  { %v1242_v22 = vmul.f32 %v2547_v47, %v1241_v52  ;;  %v1217_v52 = vsel %vm1216_vm14, %v2543_v63, %v1213_v23  ;;  %v1263_v63 = vand.u32 2147483647, %v3140_v31  ;;  %v1266_v6 = vor.u32 1.1754944e-38, %v1265_v45  ;;  %v3430_v23 = vld [vmem:[#allocation12_spill] sm:$0xff] }
 0x3d4   :  { %v1222_v18 = vsel %vm1219_vm2, %v1221_v10, %v1217_v52  ;;  %v1257_v50 = vmul.f32 %v2549_v38, %v1256_v7 }
 0x3d5   :  { %v1243_v32 = vadd.f32 %v2547_v47, %v1242_v22  ;;  %v1237_v22 = vsel %vm1234_vm0, %v1236_v53, %v1232_v8  ;;  %vm1264_vm6 = vcmp.eq.f32.partialorder %v1263_v63, 8.507059e+37 }
 0x3d6   :  { %v1274_v24 = vmul.f32 %v1272_v34, %v1237_v22  ;;  %v3432_v34 = vld [vmem:[#allocation15_spill] sm:$0xff] }
 0x3d7   :  { %v1247_v19 = vsel %vm1246_vm12, %v2547_v47, %v1243_v32  ;;  %v1258_v47 = vadd.f32 %v2549_v38, %v1257_v50  ;;  %v3433_v50 = vld [vmem:[#allocation14_spill] sm:$0xff] }
 0x3d8   :  { %v1252_v0 = vsel %vm1249_vm13, %v1251_v62, %v1247_v19 }
 0x3d9   :  { %v1269_v46 = vmul.f32 2.0, %v1252_v0  ;;  %v1262_v26 = vsel %vm1261_vm5, %v2549_v38, %v1258_v47 }
 0x3db   :  { %v2366_v36 = vadd.f32 -1.0, %v1269_v46  ;;  %v1267_v46 = vsel %vm1264_vm6, %v1266_v6, %v1262_v26 }
 0x3dd   :  { %v1275_v20 = vmul.f32 %v2366_v36, %v1222_v18 }
 0x3df   :  { %v3151_v37 = vadd.f32 %v1275_v20, %v1274_v24 }
 0x3e1   :  { %2550 = vtanh.f32 %v3151_v37 }
 0x3e7   :  { %v2551_v10 = vpop.eup %2550 }
 0x3e8   :  { %v1278_v36 = vmul.f32 %v2551_v10, %v1267_v46 }
 0x3ea   :  { %v1279_v24 = vpack.c.bf16 %v1278_v36, %v1278_v36  ;;  %v3158_v25 = vsel %vm2064_vm7, %v3102_v54, %v1278_v36 }
 0x3ec   :  { %v1281_v2 = vrot.slane %v1279_v24, 2 }
 0x3ee   :  { %1291 = vmatmul.bf16.vlgmr.msra.gmra.mxu0 %v1281_v2  ;;  %1304 = vmatmul.bf16.vlgmr.msra.gmra.mxu1 %v1281_v2 }
 0x3ef   :  { %1317 = vmatmul.bf16.vlgmr.msra.gmra.mxu2 %v1281_v2  ;;  %1330 = vmatmul.bf16.vlgmr.msra.gmra.mxu3 %v1281_v2 }
 0x3f0   :  { %1601 = vmatpush.bf16.msra.mxu0 %v2736_v42  ;;  %1614 = vmatpush.bf16.msra.mxu1 %v2738_v43 }
 0x3f1   :  { %1627 = vmatpush.bf16.msra.mxu2 %v2740_v44  ;;  %1640 = vmatpush.bf16.msra.mxu3 %v2742_v48 }
 0x3f4   :  { %1602 = vmatpush.bf16.msra.mxu0 %v2745_v55  ;;  %1615 = vmatpush.bf16.msra.mxu1 %v2749_v56 }
 0x3f5   :  { %1628 = vmatpush.bf16.msra.mxu2 %v2751_v57  ;;  %1641 = vmatpush.bf16.msra.mxu3 %v2754_v61 }
 0x3f8   :  { %1603 = vmatpush.bf16.msra.mxu0 %v2757_v3  ;;  %1616 = vmatpush.bf16.msra.mxu1 %v2761_v4 }
 0x3f9   :  { %1629 = vmatpush.bf16.msra.mxu2 %v2763_v5  ;;  %1642 = vmatpush.bf16.msra.mxu3 %v2766_v9 }
 0x3fc   :  { %1604 = vmatpush.bf16.msra.mxu0 %v2769_v15  ;;  %1617 = vmatpush.bf16.msra.mxu1 %v2773_v16 }
 0x3fd   :  { %1630 = vmatpush.bf16.msra.mxu2 %v2775_v17  ;;  %1643 = vmatpush.bf16.msra.mxu3 %v2778_v21 }
 0x400   :  { %1605 = vmatpush.bf16.msra.mxu0 %v2781_v27  ;;  %1618 = vmatpush.bf16.msra.mxu1 %v2785_v28 }
 0x401   :  { %1631 = vmatpush.bf16.msra.mxu2 %v2787_v29  ;;  %1644 = vmatpush.bf16.msra.mxu3 %v2790_v33 }
 0x404   :  { %1606 = vmatpush.bf16.msra.mxu0 %v2793_v39  ;;  %1619 = vmatpush.bf16.msra.mxu1 %v2797_v40 }
 0x405   :  { %1632 = vmatpush.bf16.msra.mxu2 %v2799_v41  ;;  %1645 = vmatpush.bf16.msra.mxu3 %v2802_v49 }
 0x408   :  { %1607 = vmatpush.bf16.msra.mxu0 %v2805_v58  ;;  %1620 = vmatpush.bf16.msra.mxu1 %v2809_v59 }
 0x409   :  { %1633 = vmatpush.bf16.msra.mxu2 %v2811_v60  ;;  %1646 = vmatpush.bf16.msra.mxu3 %v2814_v1 }
 0x40c   :  { %1608 = vmatpush.bf16.msra.mxu0 %v2817_v11  ;;  %1621 = vmatpush.bf16.msra.mxu1 %v2821_v12 }
 0x40d   :  { %1634 = vmatpush.bf16.msra.mxu2 %v2823_v13  ;;  %1647 = vmatpush.bf16.msra.mxu3 %v2826_v14 }
 0x46b   :  { %v1292_v54 = vpop.f32.mrf.mxu0  ;;  %v1305_v31 = vpop.f32.mrf.mxu1 }
 0x46c   :  { %v1339_v38 = vrot.slane %v1292_v54, 3  ;;  %v1340_v35 = vrot.slane %v1305_v31, 3 }
 0x46e   :  { %v1347_v32 = vadd.f32 %v1339_v38, %v3430_v23  ;;  %v1348_v62 = vadd.f32 %v1340_v35, %v3431_v51 }
 0x470   :  { %v2367_v30 = vmul.f32 -1.442695, %v1347_v32  ;;  %v2368_v8 = vmul.f32 -1.442695, %v1348_v62 }
 0x472   :  { %2552 = vpow2.f32 %v2367_v30  ;;  %v1318_v19 = vpop.f32.mrf.mxu2  ;;  %v1331_v53 = vpop.f32.mrf.mxu3 }
 0x473   :  { %2554 = vpow2.f32 %v2368_v8  ;;  %v1341_v0 = vrot.slane %v1318_v19, 3  ;;  %v1342_v7 = vrot.slane %v1331_v53, 3  ;;  %v1294_v52 = vpop.f32.mrf.mxu0  ;;  %v1307_v22 = vpop.f32.mrf.mxu1 }
 0x475   :  { %v1349_v18 = vadd.f32 %v1341_v0, %v3432_v34  ;;  %v1350_v20 = vadd.f32 %v1342_v7, %v3433_v50 }
 0x477   :  { %v2369_v47 = vmul.f32 -1.442695, %v1349_v18  ;;  %v2370_v45 = vmul.f32 -1.442695, %v1350_v20 }
 0x478   :  { %v2553_v63 = vpop.eup %2552 }
 0x479   :  { %v2555_v26 = vpop.eup %2554  ;;  %v1363_v6 = vadd.f32 1.0, %v2553_v63  ;;  %2556 = vpow2.f32 %v2369_v47 }
 0x47a   :  { %v1364_v10 = vadd.f32 1.0, %v2555_v26  ;;  %2558 = vpow2.f32 %v2370_v45  ;;  %v1320_v46 = vpop.f32.mrf.mxu2  ;;  %v1333_v36 = vpop.f32.mrf.mxu3 }
 0x47b   :  { %2560 = vrcp.f32 %v1363_v6  ;;  %vm1372_vm14 = vweird.f32 %v1363_v6 }
 0x47c   :  { %2562 = vrcp.f32 %v1364_v10  ;;  %vm1387_vm10 = vweird.f32 %v1364_v10  ;;  %v1391_v63 = vand.u32 2147483647, %v1364_v10  ;;  %v1393_v26 = vand.u32 2147483648, %v1364_v10 }
 0x47e   :  { %vm1392_vm4 = vcmp.eq.f32.partialorder %v1391_v63, 8.507059e+37 }
 0x47f   :  { %v2557_v24 = vpop.eup %2556 }
 0x480   :  { %v2559_v2 = vpop.eup %2558  ;;  %v1365_v54 = vadd.f32 1.0, %v2557_v24 }
 0x481   :  { %v2561_v31 = vpop.eup %2560  ;;  %v3196_v38 = vadd.f32 1.0, %v2559_v2 }
 0x482   :  { %v2563_v35 = vpop.eup %2562  ;;  %2564 = vrcp.f32 %v1365_v54  ;;  %v1368_v32 = vmul.f32 %v2561_v31, %v1363_v6  ;;  %v1408_v18 = vand.u32 2147483648, %v1365_v54  ;;  %v1406_v45 = vand.u32 2147483647, %v1365_v54 }
 0x483   :  { %v1383_v62 = vmul.f32 %v2563_v35, %v1364_v10  ;;  %2566 = vrcp.f32 %v3196_v38  ;;  %vm1388_vm8 = vweird.f32 %v2563_v35  ;;  %vm1373_vm11 = vweird.f32 %v2561_v31 }
 0x484   :  { %v1369_v8 = vsub.f32 1.0, %v1368_v32  ;;  %vm3200_vm12 = vmor %vm1387_vm10, %vm1388_vm8  ;;  %vm1402_vm13 = vweird.f32 %v1365_v54  ;;  %v1378_v32 = vand.u32 2147483648, %v1363_v6  ;;  %vm1407_vm2 = vcmp.eq.f32.partialorder %v1406_v45, 8.507059e+37 }
 0x485   :  { %v1384_v30 = vsub.f32 1.0, %v1383_v62  ;;  %v1409_v62 = vor.u32 1.1754944e-38, %v1408_v18  ;;  %vm1374_vm3 = vmor %vm1372_vm14, %vm1373_vm11  ;;  %v1394_v10 = vor.u32 1.1754944e-38, %v1393_v26  ;;  %vm1417_vm7 = vweird.f32 %v3196_v38 }
 0x486   :  { %v1370_v52 = vmul.f32 %v2561_v31, %v1369_v8  ;;  %v1379_v34 = vor.u32 1.1754944e-38, %v1378_v32  ;;  %vm2066_vm10 = vcmask 1044480  }
 0x487   :  { %v1385_v53 = vmul.f32 %v2563_v35, %v1384_v30  ;;  %v1376_v30 = vand.u32 2147483647, %v1363_v6 }
 0x488   :  { %v2565_v19 = vpop.eup %2564  ;;  %v1371_v36 = vadd.f32 %v2561_v31, %v1370_v52 }
 0x489   :  { %v1398_v0 = vmul.f32 %v2565_v19, %v1365_v54  ;;  %v2567_v7 = vpop.eup %2566  ;;  %v1386_v20 = vadd.f32 %v2563_v35, %v1385_v53  ;;  %vm1403_vm9 = vweird.f32 %v2565_v19  ;;  %v1430_v54 = vrot.slane %v3151_v37, 7 }
 0x48a   :  { %v1413_v46 = vmul.f32 %v2567_v7, %v3196_v38  ;;  %vm1404_vm0 = vmor %vm1402_vm13, %vm1403_vm9  ;;  %vm1377_vm5 = vcmp.eq.f32.partialorder %v1376_v30, 8.507059e+37  ;;  %vm1418_vm6 = vweird.f32 %v2567_v7 }
 0x48b   :  { %v1399_v22 = vsub.f32 1.0, %v1398_v0  ;;  %v1390_v8 = vsel %vm3200_vm12, %v2563_v35, %v1386_v20  ;;  %v1423_v20 = vand.u32 2147483648, %v3196_v38  ;;  %vm1419_vm8 = vmor %vm1417_vm7, %vm1418_vm6 }
 0x48c   :  { %v1414_v52 = vsub.f32 1.0, %v1413_v46 }
 0x48d   :  { %v1400_v47 = vmul.f32 %v2565_v19, %v1399_v22  ;;  %v1375_v22 = vsel %vm1374_vm3, %v2561_v31, %v1371_v36  ;;  %v1421_v31 = vand.u32 2147483647, %v3196_v38  ;;  %v1424_v45 = vor.u32 1.1754944e-38, %v1423_v20 }
 0x48e   :  { %v1380_v18 = vsel %vm1377_vm5, %v1379_v34, %v1375_v22  ;;  %v1415_v6 = vmul.f32 %v2567_v7, %v1414_v52 }
 0x48f   :  { %v1401_v2 = vadd.f32 %v2565_v19, %v1400_v47  ;;  %v1395_v47 = vsel %vm1392_vm4, %v1394_v10, %v1390_v8  ;;  %vm1422_vm9 = vcmp.eq.f32.partialorder %v1421_v31, 8.507059e+37 }
 0x490   :  { %v1432_v23 = vmul.f32 %v1430_v54, %v1395_v47 }
 0x491   :  { %v1405_v53 = vsel %vm1404_vm0, %v2565_v19, %v1401_v2  ;;  %v1416_v19 = vadd.f32 %v2567_v7, %v1415_v6  ;;  %v3436_v2 = vld [vmem:[#allocation12_spill] sm:$0xff] }
 0x492   :  { %v1410_v0 = vsel %vm1407_vm2, %v1409_v62, %v1405_v53  ;;  %v3437_v62 = vld [vmem:[#allocation13_spill] sm:$0xff] }
 0x493   :  { %v1427_v50 = vmul.f32 2.0, %v1410_v0  ;;  %v1420_v37 = vsel %vm1419_vm8, %v2567_v7, %v1416_v19 }
 0x495   :  { %v2371_v51 = vadd.f32 -1.0, %v1427_v50  ;;  %v1425_v50 = vsel %vm1422_vm9, %v1424_v45, %v1420_v37 }
 0x497   :  { %v1433_v24 = vmul.f32 %v2371_v51, %v1380_v18  ;;  %v3438_v18 = vld [vmem:[#allocation15_spill] sm:$0xff] }
 0x499   :  { %v3207_v35 = vadd.f32 %v1433_v24, %v1432_v23  ;;  %v3439_v24 = vld [vmem:[#allocation14_spill] sm:$0xff] }
 0x49b   :  { %2568 = vtanh.f32 %v3207_v35 }
 0x4a1   :  { %v2569_v34 = vpop.eup %2568 }
 0x4a2   :  { %v1436_v51 = vmul.f32 %v2569_v34, %v1425_v50 }
 0x4a4   :  { %v1437_v23 = vpack.c.bf16 %v1436_v51, %v1436_v51  ;;  %v3214_v63 = vsel %vm2066_vm10, %v3158_v25, %v1436_v51 }
 0x4a6   :  { %v1439_v26 = vshrl.u32 %v1437_v23, 16 }
 0x4a8   :  { %v1441_v46 = vrot.slane %v1439_v26, 2 }
 0x4aa   :  { %1451 = vmatmul.bf16.vlgmr.msrb.gmra.mxu0 %v1441_v46  ;;  %1464 = vmatmul.bf16.vlgmr.msrb.gmra.mxu1 %v1441_v46 }
 0x4ab   :  { %1477 = vmatmul.bf16.vlgmr.msrb.gmra.mxu2 %v1441_v46  ;;  %1490 = vmatmul.bf16.vlgmr.msrb.gmra.mxu3 %v1441_v46 }
 0x4ac   :  { %1761 = vmatpush.bf16.msrb.mxu0 %v2736_v42  ;;  %1774 = vmatpush.bf16.msrb.mxu1 %v2738_v43 }
 0x4ad   :  { %1787 = vmatpush.bf16.msrb.mxu2 %v2740_v44  ;;  %1800 = vmatpush.bf16.msrb.mxu3 %v2742_v48 }
 0x4b0   :  { %1762 = vmatpush.bf16.msrb.mxu0 %v2745_v55  ;;  %1775 = vmatpush.bf16.msrb.mxu1 %v2749_v56 }
 0x4b1   :  { %1788 = vmatpush.bf16.msrb.mxu2 %v2751_v57  ;;  %1801 = vmatpush.bf16.msrb.mxu3 %v2754_v61 }
 0x4b4   :  { %1763 = vmatpush.bf16.msrb.mxu0 %v2757_v3  ;;  %1776 = vmatpush.bf16.msrb.mxu1 %v2761_v4 }
 0x4b5   :  { %1789 = vmatpush.bf16.msrb.mxu2 %v2763_v5  ;;  %1802 = vmatpush.bf16.msrb.mxu3 %v2766_v9 }
 0x4b8   :  { %1764 = vmatpush.bf16.msrb.mxu0 %v2769_v15  ;;  %1777 = vmatpush.bf16.msrb.mxu1 %v2773_v16 }
 0x4b9   :  { %1790 = vmatpush.bf16.msrb.mxu2 %v2775_v17  ;;  %1803 = vmatpush.bf16.msrb.mxu3 %v2778_v21 }
 0x4bc   :  { %1765 = vmatpush.bf16.msrb.mxu0 %v2781_v27  ;;  %1778 = vmatpush.bf16.msrb.mxu1 %v2785_v28 }
 0x4bd   :  { %1791 = vmatpush.bf16.msrb.mxu2 %v2787_v29  ;;  %1804 = vmatpush.bf16.msrb.mxu3 %v2790_v33 }
 0x4c0   :  { %1766 = vmatpush.bf16.msrb.mxu0 %v2793_v39  ;;  %1779 = vmatpush.bf16.msrb.mxu1 %v2797_v40 }
 0x4c1   :  { %1792 = vmatpush.bf16.msrb.mxu2 %v2799_v41  ;;  %1805 = vmatpush.bf16.msrb.mxu3 %v2802_v49 }
 0x4c4   :  { %1767 = vmatpush.bf16.msrb.mxu0 %v2805_v58  ;;  %1780 = vmatpush.bf16.msrb.mxu1 %v2809_v59 }
 0x4c5   :  { %1793 = vmatpush.bf16.msrb.mxu2 %v2811_v60  ;;  %1806 = vmatpush.bf16.msrb.mxu3 %v2814_v1 }
 0x4c8   :  { %1768 = vmatpush.bf16.msrb.mxu0 %v2817_v11  ;;  %1781 = vmatpush.bf16.msrb.mxu1 %v2821_v12 }
 0x4c9   :  { %1794 = vmatpush.bf16.msrb.mxu2 %v2823_v13  ;;  %1807 = vmatpush.bf16.msrb.mxu3 %v2826_v14 }
 0x527   :  { %v1452_v25 = vpop.f32.mrf.mxu0  ;;  %v1465_v38 = vpop.f32.mrf.mxu1 }
 0x528   :  { %v1499_v7 = vrot.slane %v1452_v25, 2  ;;  %v1500_v36 = vrot.slane %v1465_v38, 2 }
 0x52a   :  { %v1507_v32 = vadd.f32 %v1499_v7, %v3436_v2  ;;  %v1508_v30 = vadd.f32 %v1500_v36, %v3437_v62 }
 0x52c   :  { %v2372_v8 = vmul.f32 -1.442695, %v1507_v32  ;;  %v2373_v53 = vmul.f32 -1.442695, %v1508_v30 }
 0x52e   :  { %2570 = vpow2.f32 %v2372_v8  ;;  %v1478_v10 = vpop.f32.mrf.mxu2  ;;  %v1491_v0 = vpop.f32.mrf.mxu3 }
 0x52f   :  { %2572 = vpow2.f32 %v2373_v53  ;;  %v1501_v52 = vrot.slane %v1478_v10, 2  ;;  %v1502_v22 = vrot.slane %v1491_v0, 2  ;;  %v1454_v47 = vpop.f32.mrf.mxu0  ;;  %v1467_v54 = vpop.f32.mrf.mxu1 }
 0x531   :  { %v1509_v6 = vadd.f32 %v1501_v52, %v3438_v18  ;;  %v1510_v19 = vadd.f32 %v1502_v22, %v3439_v24 }
 0x533   :  { %v2374_v20 = vmul.f32 -1.442695, %v1509_v6  ;;  %v2375_v31 = vmul.f32 -1.442695, %v1510_v19 }
 0x534   :  { %v2571_v37 = vpop.eup %2570 }
 0x535   :  { %v2573_v45 = vpop.eup %2572  ;;  %v1523_v34 = vadd.f32 1.0, %v2571_v37  ;;  %2574 = vpow2.f32 %v2374_v20 }
 0x536   :  { %v1524_v50 = vadd.f32 1.0, %v2573_v45  ;;  %2576 = vpow2.f32 %v2375_v31  ;;  %v1480_v51 = vpop.f32.mrf.mxu2  ;;  %v1493_v23 = vpop.f32.mrf.mxu3 }
 0x537   :  { %2578 = vrcp.f32 %v1523_v34  ;;  %vm1532_vm3 = vweird.f32 %v1523_v34 }
 0x538   :  { %2580 = vrcp.f32 %v1524_v50  ;;  %vm1547_vm13 = vweird.f32 %v1524_v50  ;;  %v1551_v37 = vand.u32 2147483647, %v1524_v50  ;;  %v1553_v45 = vand.u32 2147483648, %v1524_v50 }
 0x53a   :  { %vm1552_vm7 = vcmp.eq.f32.partialorder %v1551_v37, 8.507059e+37 }
 0x53b   :  { %v2575_v26 = vpop.eup %2574 }
 0x53c   :  { %v2577_v46 = vpop.eup %2576  ;;  %v1525_v25 = vadd.f32 1.0, %v2575_v26 }
 0x53d   :  { %v2579_v38 = vpop.eup %2578  ;;  %v3252_v7 = vadd.f32 1.0, %v2577_v46 }
 0x53e   :  { %v2581_v36 = vpop.eup %2580  ;;  %2582 = vrcp.f32 %v1525_v25  ;;  %v1528_v32 = vmul.f32 %v2579_v38, %v1523_v34  ;;  %v1568_v6 = vand.u32 2147483648, %v1525_v25  ;;  %v1566_v31 = vand.u32 2147483647, %v1525_v25 }
 0x53f   :  { %v1543_v30 = vmul.f32 %v2581_v36, %v1524_v50  ;;  %2584 = vrcp.f32 %v3252_v7  ;;  %vm1548_vm11 = vweird.f32 %v2581_v36  ;;  %vm1533_vm14 = vweird.f32 %v2579_v38 }
 0x540   :  { %v1529_v53 = vsub.f32 1.0, %v1528_v32  ;;  %vm3256_vm0 = vmor %vm1547_vm13, %vm1548_vm11  ;;  %vm1562_vm2 = vweird.f32 %v1525_v25  ;;  %v1538_v32 = vand.u32 2147483648, %v1523_v34  ;;  %vm1567_vm5 = vcmp.eq.f32.partialorder %v1566_v31, 8.507059e+37 }
 0x541   :  { %v1544_v8 = vsub.f32 1.0, %v1543_v30  ;;  %v1569_v30 = vor.u32 1.1754944e-38, %v1568_v6  ;;  %vm1534_vm6 = vmor %vm1532_vm3, %vm1533_vm14  ;;  %v1554_v50 = vor.u32 1.1754944e-38, %v1553_v45  ;;  %vm1577_vm10 = vweird.f32 %v3252_v7 }
 0x542   :  { %v1530_v47 = vmul.f32 %v2579_v38, %v1529_v53  ;;  %v1539_v18 = vor.u32 1.1754944e-38, %v1538_v32  ;;  %vm2068_vm13 = vcmask 1045504  }
 0x543   :  { %v1545_v0 = vmul.f32 %v2581_v36, %v1544_v8  ;;  %v1536_v8 = vand.u32 2147483647, %v1523_v34 }
 0x544   :  { %v2583_v10 = vpop.eup %2582  ;;  %v1531_v23 = vadd.f32 %v2579_v38, %v1530_v47 }
 0x545   :  { %v1558_v52 = vmul.f32 %v2583_v10, %v1525_v25  ;;  %v2585_v22 = vpop.eup %2584  ;;  %v1546_v19 = vadd.f32 %v2581_v36, %v1545_v0  ;;  %vm1563_vm12 = vweird.f32 %v2583_v10  ;;  %v1590_v25 = vrot.slane %v3207_v35, 7 }
 0x546   :  { %v1573_v51 = vmul.f32 %v2585_v22, %v3252_v7  ;;  %vm1564_vm4 = vmor %vm1562_vm2, %vm1563_vm12  ;;  %vm1537_vm8 = vcmp.eq.f32.partialorder %v1536_v8, 8.507059e+37  ;;  %vm1578_vm9 = vweird.f32 %v2585_v22 }
 0x547   :  { %v1559_v54 = vsub.f32 1.0, %v1558_v52  ;;  %v1550_v53 = vsel %vm3256_vm0, %v2581_v36, %v1546_v19  ;;  %v1583_v19 = vand.u32 2147483648, %v3252_v7  ;;  %vm1579_vm11 = vmor %vm1577_vm10, %vm1578_vm9 }
 0x548   :  { %v1574_v47 = vsub.f32 1.0, %v1573_v51 }
 0x549   :  { %v1560_v20 = vmul.f32 %v2583_v10, %v1559_v54  ;;  %v1535_v54 = vsel %vm1534_vm6, %v2579_v38, %v1531_v23  ;;  %v1581_v38 = vand.u32 2147483647, %v3252_v7  ;;  %v1584_v31 = vor.u32 1.1754944e-38, %v1583_v19 }
 0x54a   :  { %v1540_v6 = vsel %vm1537_vm8, %v1539_v18, %v1535_v54  ;;  %v1575_v34 = vmul.f32 %v2585_v22, %v1574_v47 }
 0x54b   :  { %v1561_v46 = vadd.f32 %v2583_v10, %v1560_v20  ;;  %v1555_v20 = vsel %vm1552_vm7, %v1554_v50, %v1550_v53  ;;  %vm1582_vm12 = vcmp.eq.f32.partialorder %v1581_v38, 8.507059e+37 }
 0x54c   :  { %v1592_v2 = vmul.f32 %v1590_v25, %v1555_v20 }
 0x54d   :  { %v1565_v0 = vsel %vm1564_vm4, %v2583_v10, %v1561_v46  ;;  %v1576_v10 = vadd.f32 %v2585_v22, %v1575_v34 }
 0x54e   :  { %v1570_v52 = vsel %vm1567_vm5, %v1569_v30, %v1565_v0 }
 0x54f   :  { %v1587_v24 = vmul.f32 2.0, %v1570_v52  ;;  %v1580_v35 = vsel %vm1579_vm11, %v2585_v22, %v1576_v10 }
 0x551   :  { %v2376_v62 = vadd.f32 -1.0, %v1587_v24  ;;  %v1585_v24 = vsel %vm1582_vm12, %v1584_v31, %v1580_v35 }
 0x553   :  { %v1593_v26 = vmul.f32 %v2376_v62, %v1540_v6 }
 0x555   :  { %v3263_v36 = vadd.f32 %v1593_v26, %v1592_v2 }
 0x557   :  { %2586 = vtanh.f32 %v3263_v36 }
 0x55d   :  { %v2587_v18 = vpop.eup %2586 }
 0x55e   :  { %v1596_v62 = vmul.f32 %v2587_v18, %v1585_v24 }
 0x560   :  { %v1597_v2 = vpack.c.bf16 %v1596_v62, %v1596_v62  ;;  %v3270_v37 = vsel %vm2068_vm13, %v3214_v63, %v1596_v62 }
 0x562   :  { %v1599_v45 = vrot.slane %v1597_v2, 3 }
 0x564   :  { %1609 = vmatmul.bf16.vlgmr.msra.gmra.mxu0 %v1599_v45  ;;  %1622 = vmatmul.bf16.vlgmr.msra.gmra.mxu1 %v1599_v45 }
 0x565   :  { %1635 = vmatmul.bf16.vlgmr.msra.gmra.mxu2 %v1599_v45  ;;  %1648 = vmatmul.bf16.vlgmr.msra.gmra.mxu3 %v1599_v45 }
 0x566   :  { %1904 = vmatpush.bf16.msra.mxu0 %v2736_v42  ;;  %1917 = vmatpush.bf16.msra.mxu1 %v2738_v43 }
 0x567   :  { %1930 = vmatpush.bf16.msra.mxu2 %v2740_v44  ;;  %1943 = vmatpush.bf16.msra.mxu3 %v2742_v48 }
 0x56a   :  { %1905 = vmatpush.bf16.msra.mxu0 %v2745_v55  ;;  %1918 = vmatpush.bf16.msra.mxu1 %v2749_v56  ;;  %v3442_v55 = vld [vmem:[#allocation12_spill] sm:$0xff] }
 0x56b   :  { %1931 = vmatpush.bf16.msra.mxu2 %v2751_v57  ;;  %1944 = vmatpush.bf16.msra.mxu3 %v2754_v61  ;;  %v3443_v57 = vld [vmem:[#allocation13_spill] sm:$0xff] }
 0x56e   :  { %1906 = vmatpush.bf16.msra.mxu0 %v2757_v3  ;;  %1919 = vmatpush.bf16.msra.mxu1 %v2761_v4 }
 0x56f   :  { %1932 = vmatpush.bf16.msra.mxu2 %v2763_v5  ;;  %1945 = vmatpush.bf16.msra.mxu3 %v2766_v9 }
 0x572   :  { %1907 = vmatpush.bf16.msra.mxu0 %v2769_v15  ;;  %1920 = vmatpush.bf16.msra.mxu1 %v2773_v16 }
 0x573   :  { %1933 = vmatpush.bf16.msra.mxu2 %v2775_v17  ;;  %1946 = vmatpush.bf16.msra.mxu3 %v2778_v21 }
 0x576   :  { %1908 = vmatpush.bf16.msra.mxu0 %v2781_v27  ;;  %1921 = vmatpush.bf16.msra.mxu1 %v2785_v28  ;;  %v3444_v27 = vld [vmem:[#allocation15_spill] sm:$0xff] }
 0x577   :  { %1934 = vmatpush.bf16.msra.mxu2 %v2787_v29  ;;  %1947 = vmatpush.bf16.msra.mxu3 %v2790_v33  ;;  %v3445_v29 = vld [vmem:[#allocation14_spill] sm:$0xff] }
 0x57a   :  { %1909 = vmatpush.bf16.msra.mxu0 %v2793_v39  ;;  %1922 = vmatpush.bf16.msra.mxu1 %v2797_v40 }
 0x57b   :  { %1935 = vmatpush.bf16.msra.mxu2 %v2799_v41  ;;  %1948 = vmatpush.bf16.msra.mxu3 %v2802_v49 }
 0x57e   :  { %1910 = vmatpush.bf16.msra.mxu0 %v2805_v58  ;;  %1923 = vmatpush.bf16.msra.mxu1 %v2809_v59 }
 0x57f   :  { %1936 = vmatpush.bf16.msra.mxu2 %v2811_v60  ;;  %1949 = vmatpush.bf16.msra.mxu3 %v2814_v1 }
 0x582   :  { %1911 = vmatpush.bf16.msra.mxu0 %v2817_v11  ;;  %1924 = vmatpush.bf16.msra.mxu1 %v2821_v12 }
 0x583   :  { %1937 = vmatpush.bf16.msra.mxu2 %v2823_v13  ;;  %1950 = vmatpush.bf16.msra.mxu3 %v2826_v14 }
 0x5e1   :  { %v1610_v42 = vpop.f32.mrf.mxu0  ;;  %v1623_v43 = vpop.f32.mrf.mxu1 }
 0x5e2   :  { %v1657_v44 = vrot.slane %v1610_v42, 1  ;;  %v1658_v48 = vrot.slane %v1623_v43, 1 }
 0x5e4   :  { %v1665_v56 = vadd.f32 %v1657_v44, %v3442_v55  ;;  %v1666_v61 = vadd.f32 %v1658_v48, %v3443_v57  ;;  %v1748_v55 = vrot.slane %v3263_v36, 7 }
 0x5e6   :  { %v2377_v3 = vmul.f32 -1.442695, %v1665_v56  ;;  %v2378_v4 = vmul.f32 -1.442695, %v1666_v61 }
 0x5e8   :  { %2588 = vpow2.f32 %v2377_v3  ;;  %v1636_v5 = vpop.f32.mrf.mxu2  ;;  %v1649_v9 = vpop.f32.mrf.mxu3 }
 0x5e9   :  { %2590 = vpow2.f32 %v2378_v4  ;;  %v1659_v15 = vrot.slane %v1636_v5, 1  ;;  %v1660_v16 = vrot.slane %v1649_v9, 1  ;;  %v1612_v17 = vpop.f32.mrf.mxu0  ;;  %v1625_v21 = vpop.f32.mrf.mxu1 }
 0x5eb   :  { %v1667_v28 = vadd.f32 %v1659_v15, %v3444_v27  ;;  %v1668_v33 = vadd.f32 %v1660_v16, %v3445_v29 }
 0x5ed   :  { %v2379_v39 = vmul.f32 -1.442695, %v1667_v28  ;;  %v2380_v40 = vmul.f32 -1.442695, %v1668_v33 }
 0x5ee   :  { %v2589_v41 = vpop.eup %2588 }
 0x5ef   :  { %v2591_v49 = vpop.eup %2590  ;;  %v1681_v58 = vadd.f32 1.0, %v2589_v41  ;;  %2592 = vpow2.f32 %v2379_v39 }
 0x5f0   :  { %v1682_v59 = vadd.f32 1.0, %v2591_v49  ;;  %2594 = vpow2.f32 %v2380_v40  ;;  %v1638_v60 = vpop.f32.mrf.mxu2  ;;  %v1651_v1 = vpop.f32.mrf.mxu3 }
 0x5f1   :  { %2596 = vrcp.f32 %v1681_v58  ;;  %vm1690_vm6 = vweird.f32 %v1681_v58  ;;  %v1696_v38 = vand.u32 2147483648, %v1681_v58  ;;  %v1694_v31 = vand.u32 2147483647, %v1681_v58  ;;  %v3449_v60 = vld [vmem:[#allocation9_spill] sm:$0xff] }
 0x5f2   :  { %2598 = vrcp.f32 %v1682_v59  ;;  %vm1705_vm2 = vweird.f32 %v1682_v59  ;;  %v1709_v25 = vand.u32 2147483647, %v1682_v59  ;;  %v1711_v6 = vand.u32 2147483648, %v1682_v59 }
 0x5f3   :  { %v1697_v44 = vor.u32 1.1754944e-38, %v1696_v38  ;;  %vm1695_vm11 = vcmp.eq.f32.partialorder %v1694_v31, 8.507059e+37 }
 0x5f4   :  { %v1712_v62 = vor.u32 1.1754944e-38, %v1711_v6  ;;  %vm1710_vm10 = vcmp.eq.f32.partialorder %v1709_v25, 8.507059e+37 }
 0x5f5   :  { %v2593_v11 = vpop.eup %2592 }
 0x5f6   :  { %v2595_v12 = vpop.eup %2594  ;;  %v1683_v13 = vadd.f32 1.0, %v2593_v11 }
 0x5f7   :  { %v2597_v14 = vpop.eup %2596  ;;  %v3308_v63 = vadd.f32 1.0, %v2595_v12 }
 0x5f8   :  { %v2599_v7 = vpop.eup %2598  ;;  %2600 = vrcp.f32 %v1683_v13  ;;  %v1686_v22 = vmul.f32 %v2597_v14, %v1681_v58  ;;  %v1726_v52 = vand.u32 2147483648, %v1683_v13  ;;  %v1724_v20 = vand.u32 2147483647, %v1683_v13  ;;  %v3448_v58 = vld [vmem:[#allocation8_spill] sm:$0xff] }
 0x5f9   :  { %v1701_v51 = vmul.f32 %v2599_v7, %v1682_v59  ;;  %2602 = vrcp.f32 %v3308_v63  ;;  %vm1706_vm14 = vweird.f32 %v2599_v7  ;;  %vm1691_vm3 = vweird.f32 %v2597_v14 }
 0x5fa   :  { %v1687_v46 = vsub.f32 1.0, %v1686_v22  ;;  %vm3312_vm4 = vmor %vm1705_vm2, %vm1706_vm14  ;;  %vm1720_vm5 = vweird.f32 %v1683_v13  ;;  %v1727_v35 = vor.u32 1.1754944e-38, %v1726_v52  ;;  %vm1725_vm8 = vcmp.eq.f32.partialorder %v1724_v20, 8.507059e+37 }
 0x5fb   :  { %v1702_v23 = vsub.f32 1.0, %v1701_v51  ;;  %vm1692_vm9 = vmor %vm1690_vm6, %vm1691_vm3  ;;  %v1741_v15 = vand.u32 2147483648, %v3308_v63  ;;  %vm1735_vm13 = vweird.f32 %v3308_v63  ;;  %v1739_v16 = vand.u32 2147483647, %v3308_v63 }
 0x5fc   :  { %v1688_v0 = vmul.f32 %v2597_v14, %v1687_v46  ;;  %vm2070_vm2 = vcmask 1046528  }
 0x5fd   :  { %v1703_v30 = vmul.f32 %v2599_v7, %v1702_v23  ;;  %v1742_v17 = vor.u32 1.1754944e-38, %v1741_v15 }
 0x5fe   :  { %v2601_v32 = vpop.eup %2600  ;;  %v1689_v26 = vadd.f32 %v2597_v14, %v1688_v0 }
 0x5ff   :  { %v1716_v8 = vmul.f32 %v2601_v32, %v1683_v13  ;;  %v2603_v53 = vpop.eup %2602  ;;  %v1704_v47 = vadd.f32 %v2599_v7, %v1703_v30  ;;  %vm1721_vm0 = vweird.f32 %v2601_v32 }
 0x600   :  { %v1731_v34 = vmul.f32 %v2603_v53, %v3308_v63  ;;  %vm1722_vm7 = vmor %vm1720_vm5, %vm1721_vm0  ;;  %v1693_v42 = vsel %vm1692_vm9, %v2597_v14, %v1689_v26  ;;  %vm1736_vm12 = vweird.f32 %v2603_v53  ;;  %vm1740_vm0 = vcmp.eq.f32.partialorder %v1739_v16, 8.507059e+37  ;;  %v3450_v14 = vld [vmem:[#allocation10_spill] sm:$0xff] }
 0x601   :  { %v1717_v50 = vsub.f32 1.0, %v1716_v8  ;;  %v1708_v18 = vsel %vm3312_vm4, %v2599_v7, %v1704_v47  ;;  %v1698_v57 = vsel %vm1695_vm11, %v1697_v44, %v1693_v42  ;;  %vm1737_vm14 = vmor %vm1735_vm13, %vm1736_vm12  ;;  %v3451_v7 = vld [vmem:[#allocation11_spill] sm:$0xff] }
 0x602   :  { %v1732_v45 = vsub.f32 1.0, %v1731_v34  ;;  %v1713_v48 = vsel %vm1710_vm10, %v1712_v62, %v1708_v18 }
 0x603   :  { %v1718_v54 = vmul.f32 %v2601_v32, %v1717_v50  ;;  %v1750_v3 = vmul.f32 %v1748_v55, %v1713_v48 }
 0x604   :  { %v1733_v61 = vmul.f32 %v2603_v53, %v1732_v45 }
 0x605   :  { %v1719_v19 = vadd.f32 %v2601_v32, %v1718_v54 }
 0x606   :  { %v1734_v9 = vadd.f32 %v2603_v53, %v1733_v61 }
 0x607   :  { %v1723_v24 = vsel %vm1722_vm7, %v2601_v32, %v1719_v19 }
 0x608   :  { %v1728_v2 = vsel %vm1725_vm8, %v1727_v35, %v1723_v24  ;;  %v1738_v36 = vsel %vm1737_vm14, %v2603_v53, %v1734_v9 }
 0x609   :  { %v1745_v43 = vmul.f32 2.0, %v1728_v2  ;;  %v1743_v27 = vsel %vm1740_vm0, %v1742_v17, %v1738_v36 }
 0x60b   :  { %v2381_v56 = vadd.f32 -1.0, %v1745_v43 }
 0x60d   :  { %v1751_v4 = vmul.f32 %v2381_v56, %v1698_v57 }
 0x60f   :  { %v3319_v5 = vadd.f32 %v1751_v4, %v1750_v3 }
 0x611   :  { %2604 = vtanh.f32 %v3319_v5 }
 0x617   :  { %v2605_v21 = vpop.eup %2604 }
 0x618   :  { %v1754_v28 = vmul.f32 %v2605_v21, %v1743_v27 }
 0x61a   :  { %v1755_v29 = vpack.c.bf16 %v1754_v28, %v1754_v28  ;;  %v2071_v33 = vsel %vm2070_vm2, %v3270_v37, %v1754_v28 }
 0x61b   :  { %2074 = vst [vmem:[%s3382_s4] sm:$0xff] %v2071_v33 }
 0x61c   :  { %v1757_v39 = vshrl.u32 %v1755_v29, 16 }
 0x61e   :  { %v1759_v40 = vrot.slane %v1757_v39, 3 }
 0x620   :  { %1769 = vmatmul.bf16.vlgmr.msrb.gmra.mxu0 %v1759_v40  ;;  %1782 = vmatmul.bf16.vlgmr.msrb.gmra.mxu1 %v1759_v40 }
 0x621   :  { %1795 = vmatmul.bf16.vlgmr.msrb.gmra.mxu2 %v1759_v40  ;;  %1808 = vmatmul.bf16.vlgmr.msrb.gmra.mxu3 %v1759_v40  ;;  %v1896_v40 = vrot.slane %v3319_v5, 7 }
 0x69d   :  { %v1770_v41 = vpop.f32.mrf.mxu0  ;;  %v1783_v49 = vpop.f32.mrf.mxu1 }
 0x69e   :  { %v1813_v59 = vadd.f32 %v1770_v41, %v3448_v58  ;;  %v1814_v1 = vadd.f32 %v1783_v49, %v3449_v60 }
 0x6a0   :  { %v2382_v11 = vmul.f32 -1.442695, %v1813_v59  ;;  %v2383_v12 = vmul.f32 -1.442695, %v1814_v1 }
 0x6a2   :  { %2606 = vpow2.f32 %v2382_v11 }
 0x6a3   :  { %2608 = vpow2.f32 %v2383_v12 }
 0x6a4   :  { %v1796_v37 = vpop.f32.mrf.mxu2  ;;  %v1809_v13 = vpop.f32.mrf.mxu3 }
 0x6a5   :  { %v1815_v63 = vadd.f32 %v1796_v37, %v3450_v14  ;;  %v1816_v22 = vadd.f32 %v1809_v13, %v3451_v7  ;;  %v1772_v51 = vpop.f32.mrf.mxu0  ;;  %v1785_v23 = vpop.f32.mrf.mxu1 }
 0x6a7   :  { %v2384_v46 = vmul.f32 -1.442695, %v1815_v63  ;;  %v2385_v32 = vmul.f32 -1.442695, %v1816_v22 }
 0x6a8   :  { %v2607_v30 = vpop.eup %2606 }
 0x6a9   :  { %v2609_v8 = vpop.eup %2608  ;;  %v1829_v53 = vadd.f32 1.0, %v2607_v30  ;;  %2610 = vpow2.f32 %v2384_v46 }
 0x6aa   :  { %v1830_v0 = vadd.f32 1.0, %v2609_v8  ;;  %2612 = vpow2.f32 %v2385_v32 }
 0x6ab   :  { %2614 = vrcp.f32 %v1829_v53  ;;  %vm1838_vm9 = vweird.f32 %v1829_v53  ;;  %v1844_v4 = vand.u32 2147483648, %v1829_v53  ;;  %v1842_v15 = vand.u32 2147483647, %v1829_v53 }
 0x6ac   :  { %2616 = vrcp.f32 %v1830_v0  ;;  %v1798_v50 = vpop.f32.mrf.mxu2  ;;  %v1811_v52 = vpop.f32.mrf.mxu3  ;;  %vm1853_vm5 = vweird.f32 %v1830_v0  ;;  %v1857_v48 = vand.u32 2147483647, %v1830_v0  ;;  %v1859_v55 = vand.u32 2147483648, %v1830_v0 }
 0x6ad   :  { %v1845_v33 = vor.u32 1.1754944e-38, %v1844_v4  ;;  %vm1843_vm14 = vcmp.eq.f32.partialorder %v1842_v15, 8.507059e+37 }
 0x6ae   :  { %v1860_v17 = vor.u32 1.1754944e-38, %v1859_v55  ;;  %vm1858_vm13 = vcmp.eq.f32.partialorder %v1857_v48, 8.507059e+37 }
 0x6af   :  { %v2611_v47 = vpop.eup %2610 }
 0x6b0   :  { %v2613_v54 = vpop.eup %2612  ;;  %v1831_v20 = vadd.f32 1.0, %v2611_v47 }
 0x6b1   :  { %v2615_v25 = vpop.eup %2614  ;;  %v3333_v6 = vadd.f32 1.0, %v2613_v54 }
 0x6b2   :  { %v2617_v34 = vpop.eup %2616  ;;  %2618 = vrcp.f32 %v1831_v20  ;;  %v1834_v26 = vmul.f32 %v2615_v25, %v1829_v53  ;;  %v1874_v45 = vand.u32 2147483648, %v1831_v20  ;;  %v1872_v44 = vand.u32 2147483647, %v1831_v20 }
 0x6b3   :  { %v1849_v10 = vmul.f32 %v2617_v34, %v1830_v0  ;;  %2620 = vrcp.f32 %v3333_v6  ;;  %vm1854_vm3 = vweird.f32 %v2617_v34  ;;  %vm1839_vm6 = vweird.f32 %v2615_v25 }
 0x6b4   :  { %v1835_v38 = vsub.f32 1.0, %v1834_v26  ;;  %vm3337_vm7 = vmor %vm1853_vm5, %vm1854_vm3  ;;  %vm1868_vm8 = vweird.f32 %v1831_v20  ;;  %v1875_v9 = vor.u32 1.1754944e-38, %v1874_v45  ;;  %vm1873_vm11 = vcmp.eq.f32.partialorder %v1872_v44, 8.507059e+37 }
 0x6b5   :  { %v1850_v19 = vsub.f32 1.0, %v1849_v10  ;;  %vm1840_vm12 = vmor %vm1838_vm9, %vm1839_vm6  ;;  %v1889_v13 = vand.u32 2147483648, %v3333_v6  ;;  %vm1883_vm2 = vweird.f32 %v3333_v6  ;;  %v1887_v63 = vand.u32 2147483647, %v3333_v6 }
 0x6b6   :  { %v1836_v62 = vmul.f32 %v2615_v25, %v1835_v38 }
 0x6b7   :  { %v1851_v31 = vmul.f32 %v2617_v34, %v1850_v19  ;;  %v1890_v5 = vor.u32 1.1754944e-38, %v1889_v13 }
 0x6b8   :  { %v2619_v35 = vpop.eup %2618  ;;  %v1837_v57 = vadd.f32 %v2615_v25, %v1836_v62 }
 0x6b9   :  { %v1864_v18 = vmul.f32 %v2619_v35, %v1831_v20  ;;  %v2621_v24 = vpop.eup %2620  ;;  %v1852_v42 = vadd.f32 %v2617_v34, %v1851_v31  ;;  %vm1869_vm4 = vweird.f32 %v2619_v35 }
 0x6ba   :  { %v1879_v56 = vmul.f32 %v2621_v24, %v3333_v6  ;;  %vm1870_vm10 = vmor %vm1868_vm8, %vm1869_vm4  ;;  %v1841_v28 = vsel %vm1840_vm12, %v2615_v25, %v1837_v57  ;;  %vm1884_vm0 = vweird.f32 %v2621_v24  ;;  %vm1888_vm4 = vcmp.eq.f32.partialorder %v1887_v63, 8.507059e+37 }
 0x6bb   :  { %v1865_v2 = vsub.f32 1.0, %v1864_v18  ;;  %v1856_v16 = vsel %vm3337_vm7, %v2617_v34, %v1852_v42  ;;  %v1846_v49 = vsel %vm1843_vm14, %v1845_v33, %v1841_v28  ;;  %vm1885_vm3 = vmor %vm1883_vm2, %vm1884_vm0 }
 0x6bc   :  { %v1880_v27 = vsub.f32 1.0, %v1879_v56  ;;  %v1861_v39 = vsel %vm1858_vm13, %v1860_v17, %v1856_v16 }
 0x6bd   :  { %v1866_v43 = vmul.f32 %v2619_v35, %v1865_v2  ;;  %v1898_v1 = vmul.f32 %v1896_v40, %v1861_v39 }
 0x6be   :  { %v1881_v59 = vmul.f32 %v2621_v24, %v1880_v27 }
 0x6bf   :  { %v1867_v3 = vadd.f32 %v2619_v35, %v1866_v43 }
 0x6c0   :  { %v1882_v37 = vadd.f32 %v2621_v24, %v1881_v59 }
 0x6c1   :  { %v1871_v36 = vsel %vm1870_vm10, %v2619_v35, %v1867_v3 }
 0x6c2   :  { %v1876_v21 = vsel %vm1873_vm11, %v1875_v9, %v1871_v36  ;;  %v1886_v22 = vsel %vm1885_vm3, %v2621_v24, %v1882_v37 }
 0x6c3   :  { %v1893_v29 = vmul.f32 2.0, %v1876_v21  ;;  %v1891_v23 = vsel %vm1888_vm4, %v1890_v5, %v1886_v22 }
 0x6c5   :  { %v2386_v41 = vadd.f32 -1.0, %v1893_v29 }
 0x6c7   :  { %v1899_v11 = vmul.f32 %v2386_v41, %v1846_v49 }
 0x6c9   :  { %v3344_v12 = vadd.f32 %v1899_v11, %v1898_v1 }
 0x6cb   :  { %2622 = vtanh.f32 %v3344_v12 }
 0x6d1   :  { %v2623_v51 = vpop.eup %2622 }
 0x6d2   :  { %v3350_v46 = vmul.f32 %v2623_v51, %v1891_v23 }
 0x6d4   :  { %v1903_v32 = vpack.c.bf16 %v3350_v46, %v3350_v46 }
 0x6d6   :  { %1912 = vmatmul.bf16.vlgmr.msra.gmra.mxu0 %v1903_v32  ;;  %1925 = vmatmul.bf16.vlgmr.msra.gmra.mxu1 %v1903_v32 }
 0x6d7   :  { %1938 = vmatmul.bf16.vlgmr.msra.gmra.mxu2 %v1903_v32  ;;  %1951 = vmatmul.bf16.vlgmr.msra.gmra.mxu3 %v1903_v32 }
 0x753   :  { %v1913_v30 = vpop.f32.mrf.mxu0  ;;  %v1926_v8 = vpop.f32.mrf.mxu1 }
 0x754   :  { %v1960_v53 = vrot.slane %v1913_v30, 7  ;;  %v1961_v0 = vrot.slane %v1926_v8, 7  ;;  %v2051_v30 = vrot.slane %v3344_v12, 7 }
 0x756   :  { %v1968_v50 = vadd.f32 %v1960_v53, %v3448_v58  ;;  %v1969_v52 = vadd.f32 %v1961_v0, %v3449_v60 }
 0x758   :  { %v2387_v47 = vmul.f32 -1.442695, %v1968_v50  ;;  %v2388_v54 = vmul.f32 -1.442695, %v1969_v52 }
 0x75a   :  { %2624 = vpow2.f32 %v2387_v47  ;;  %v1939_v20 = vpop.f32.mrf.mxu2  ;;  %v1952_v25 = vpop.f32.mrf.mxu3 }
 0x75b   :  { %2626 = vpow2.f32 %v2388_v54  ;;  %v1962_v6 = vrot.slane %v1939_v20, 7  ;;  %v1963_v34 = vrot.slane %v1952_v25, 7  ;;  %v1915_v26 = vpop.f32.mrf.mxu0  ;;  %v1928_v10 = vpop.f32.mrf.mxu1 }
 0x75d   :  { %v1970_v19 = vadd.f32 %v1962_v6, %v3450_v14  ;;  %v1971_v38 = vadd.f32 %v1963_v34, %v3451_v7 }
 0x75f   :  { %v2389_v35 = vmul.f32 -1.442695, %v1970_v19  ;;  %v2390_v31 = vmul.f32 -1.442695, %v1971_v38 }
 0x760   :  { %v2625_v18 = vpop.eup %2624 }
 0x761   :  { %v2627_v58 = vpop.eup %2626  ;;  %v1984_v24 = vadd.f32 1.0, %v2625_v18  ;;  %2628 = vpow2.f32 %v2389_v35 }
 0x762   :  { %v1985_v60 = vadd.f32 1.0, %v2627_v58  ;;  %2630 = vpow2.f32 %v2390_v31  ;;  %v1941_v62 = vpop.f32.mrf.mxu2  ;;  %v1954_v2 = vpop.f32.mrf.mxu3 }
 0x763   :  { %2632 = vrcp.f32 %v1984_v24  ;;  %vm1993_vm11 = vweird.f32 %v1984_v24  ;;  %v1999_v49 = vand.u32 2147483648, %v1984_v24  ;;  %v1997_v1 = vand.u32 2147483647, %v1984_v24 }
 0x764   :  { %2634 = vrcp.f32 %v1985_v60  ;;  %vm2008_vm7 = vweird.f32 %v1985_v60  ;;  %v2012_v28 = vand.u32 2147483647, %v1985_v60  ;;  %v2014_v29 = vand.u32 2147483648, %v1985_v60 }
 0x765   :  { %v2000_v23 = vor.u32 1.1754944e-38, %v1999_v49  ;;  %vm1998_vm2 = vcmp.eq.f32.partialorder %v1997_v1, 8.507059e+37 }
 0x766   :  { %v2015_v13 = vor.u32 1.1754944e-38, %v2014_v29  ;;  %vm2013_vm0 = vcmp.eq.f32.partialorder %v2012_v28, 8.507059e+37 }
 0x767   :  { %v2629_v45 = vpop.eup %2628 }
 0x768   :  { %v2631_v42 = vpop.eup %2630  ;;  %v1986_v43 = vadd.f32 1.0, %v2629_v45 }
 0x769   :  { %v2633_v44 = vpop.eup %2632  ;;  %v3358_v48 = vadd.f32 1.0, %v2631_v42 }
 0x76a   :  { %v2635_v14 = vpop.eup %2634  ;;  %2636 = vrcp.f32 %v1986_v43  ;;  %v1989_v7 = vmul.f32 %v2633_v44, %v1984_v24  ;;  %v2029_v36 = vand.u32 2147483648, %v1986_v43  ;;  %v2027_v27 = vand.u32 2147483647, %v1986_v43 }
 0x76b   :  { %v2004_v55 = vmul.f32 %v2635_v14, %v1985_v60  ;;  %2638 = vrcp.f32 %v3358_v48  ;;  %vm2009_vm5 = vweird.f32 %v2635_v14  ;;  %vm1994_vm8 = vweird.f32 %v2633_v44 }
 0x76c   :  { %v1990_v57 = vsub.f32 1.0, %v1989_v7  ;;  %vm3362_vm9 = vmor %vm2008_vm7, %vm2009_vm5  ;;  %vm2023_vm10 = vweird.f32 %v1986_v43  ;;  %v2030_v59 = vor.u32 1.1754944e-38, %v2029_v36  ;;  %vm2028_vm13 = vcmp.eq.f32.partialorder %v2027_v27, 8.507059e+37 }
 0x76d   :  { %v2005_v56 = vsub.f32 1.0, %v2004_v55  ;;  %vm1995_vm14 = vmor %vm1993_vm11, %vm1994_vm8  ;;  %v2044_v20 = vand.u32 2147483648, %v3358_v48  ;;  %vm2038_vm4 = vweird.f32 %v3358_v48  ;;  %v2042_v25 = vand.u32 2147483647, %v3358_v48 }
 0x76e   :  { %v1991_v15 = vmul.f32 %v2633_v44, %v1990_v57 }
 0x76f   :  { %v2006_v3 = vmul.f32 %v2635_v14, %v2005_v56  ;;  %v2045_v34 = vor.u32 1.1754944e-38, %v2044_v20 }
 0x770   :  { %v2637_v61 = vpop.eup %2636  ;;  %v1992_v39 = vadd.f32 %v2633_v44, %v1991_v15 }
 0x771   :  { %v2019_v4 = vmul.f32 %v2637_v61, %v1986_v43  ;;  %v2639_v9 = vpop.eup %2638  ;;  %v2007_v17 = vadd.f32 %v2635_v14, %v2006_v3  ;;  %vm2024_vm6 = vweird.f32 %v2637_v61 }
 0x772   :  { %v2034_v33 = vmul.f32 %v2639_v9, %v3358_v48  ;;  %vm2025_vm12 = vmor %vm2023_vm10, %vm2024_vm6  ;;  %v1996_v5 = vsel %vm1995_vm14, %v2633_v44, %v1992_v39  ;;  %vm2039_vm3 = vweird.f32 %v2639_v9  ;;  %vm2043_vm6 = vcmp.eq.f32.partialorder %v2042_v25, 8.507059e+37 }
 0x773   :  { %v2020_v16 = vsub.f32 1.0, %v2019_v4  ;;  %v2011_v11 = vsel %vm3362_vm9, %v2635_v14, %v2007_v17  ;;  %v2001_v53 = vsel %vm1998_vm2, %v2000_v23, %v1996_v5  ;;  %vm2040_vm5 = vmor %vm2038_vm4, %vm2039_vm3 }
 0x774   :  { %v2035_v22 = vsub.f32 1.0, %v2034_v33  ;;  %v2016_v32 = vsel %vm2013_vm0, %v2015_v13, %v2011_v11 }
 0x775   :  { %v2021_v21 = vmul.f32 %v2637_v61, %v2020_v16  ;;  %v2053_v50 = vmul.f32 %v2051_v30, %v2016_v32 }
 0x776   :  { %v2036_v0 = vmul.f32 %v2639_v9, %v2035_v22 }
 0x777   :  { %v2022_v41 = vadd.f32 %v2637_v61, %v2021_v21 }
 0x778   :  { %v2037_v54 = vadd.f32 %v2639_v9, %v2036_v0 }
 0x779   :  { %v2026_v37 = vsel %vm2025_vm12, %v2637_v61, %v2022_v41 }
 0x77a   :  { %v2031_v63 = vsel %vm2028_vm13, %v2030_v59, %v2026_v37  ;;  %v2041_v6 = vsel %vm2040_vm5, %v2639_v9, %v2037_v54 }
 0x77b   :  { %v2048_v51 = vmul.f32 2.0, %v2031_v63  ;;  %v2046_v26 = vsel %vm2043_vm6, %v2045_v34, %v2041_v6 }
 0x77d   :  { %v2391_v8 = vadd.f32 -1.0, %v2048_v51 }
 0x77f   :  { %v2054_v52 = vmul.f32 %v2391_v8, %v2001_v53 }
 0x781   :  { %v2055_v47 = vadd.f32 %v2054_v52, %v2053_v50 }
 0x783   :  { %2640 = vtanh.f32 %v2055_v47 }
 0x789   :  { %v2641_v12 = vpop.eup %2640 }
 0x78a   :  { %v2057_v10 = vmul.f32 %v2641_v12, %v2046_v26 }
 0x78c   :  { %v2072_v19 = vsel %vm2058_vm15, %v3350_v46, %v2057_v10 }
 0x78d   :  { %v2073_v38 = vsel %vm2060_vm1, %v2072_v19, 0.0 }
 0x78e   :  { %2075 = vst [vmem:[%s3382_s4 + $0x8] sm:$0xff] %v2073_v38 }
 0x78f   :  { %2080 = vsyncpa [#allocation3], 1 }
 0x790   :  { %2081 = vsyncpa [#allocation5], 1 }

</bundles_post_ra>
